<compile_context>
chip_gen: v7x
topology: tpu7x:2x2x1
jax: 0.10.0
libtpu: 0.0.40
codegen_flags: <defaults>
</compile_context>

<pallas_src>
import math

import jax
import jax.numpy as jnp
from jax.experimental import pallas as pl
from jax.experimental.pallas import tpu as pltpu

# ---- mini-BERT config (scaled down from bert-base-uncased: 768->32, 12->2) ----
VOCAB = 100
MAX_POS = 16
TYPE_VOCAB = 2
HIDDEN = 32
N_LAYERS = 2
N_HEADS = 2
HEAD_DIM = HIDDEN // N_HEADS
FFN = 64
LN_EPS = 1e-12


# --------------------------- fused Pallas kernel -------------------------------
def _fused_bert_kernel(emb_ref, mask_ref,
                       emb_g_ref, emb_b_ref,
                       wqkv_ref, bqkv_ref, wo_ref, bo_ref,
                       ln1g_ref, ln1b_ref,
                       w1_ref, b1_ref, w2_ref, b2_ref,
                       ln2g_ref, ln2b_ref,
                       wout_ref, bout_ref,
                       out_ref):
    B, S, H = emb_ref.shape
    Dh = H // N_HEADS

    def layernorm(x, g, b):                      # f32 elementwise path
        mu = jnp.mean(x, axis=-1, keepdims=True)
        var = jnp.mean((x - mu) * (x - mu), axis=-1, keepdims=True)
        return (x - mu) * jax.lax.rsqrt(var + LN_EPS) * g + b

    def gelu(y):                                 # f32 elementwise path
        # TODO(synk): HF BERT uses the exact erf-based gelu; tanh approx here.
        c = math.sqrt(2.0 / math.pi)
        return 0.5 * y * (1.0 + jnp.tanh(c * (y + 0.044715 * y * y * y)))

    def mm(a, w):
        # MXU is bf16-native on v5e/v6e/v7x: bf16 operands, f32 accumulation.
        return jnp.dot(a.astype(jnp.bfloat16), w.astype(jnp.bfloat16),
                       preferred_element_type=jnp.float32)

    # ---- embedding LayerNorm (no residual / no zeros DMA) ----
    x = layernorm(emb_ref[...].reshape(B * S, H), emb_g_ref[...], emb_b_ref[...])

    # ---- additive attention mask, materialized ONCE at the score shape ----
    add_mask = jnp.broadcast_to(
        ((1.0 - mask_ref[...]) * (-1e9)).reshape(B, 1, S), (B, S, S))   # (B,S,S) f32

    # ---- encoder layers (static loop, weights indexed with static l) ----
    for l in range(N_LAYERS):
        # fused QKV projection: one (H, 3H) bf16 matmul; the 1/sqrt(Dh) scale is
        # already folded into the Q columns of wqkv/bqkv at parameter-prep time.
        qkv = (mm(x, wqkv_ref[l]) + bqkv_ref[l]).reshape(B, S, 3 * H)

        attn = jnp.zeros((B * S, H), jnp.float32)
        # TODO(synk): a single 'bqhd,bkhd->bhqk' einsum (two batch dims) is not
        # reliably lowered by Mosaic, so N_HEADS(=2) single-batch-dim einsums are
        # kept; the lane-axis concat of head outputs IS removed (per-head output
        # projection is accumulated instead).
        for hidx in range(N_HEADS):
            qh = qkv[:, :, hidx * Dh:(hidx + 1) * Dh]                    # (B,S,Dh)
            kh = qkv[:, :, H + hidx * Dh:H + (hidx + 1) * Dh]
            vh = qkv[:, :, 2 * H + hidx * Dh:2 * H + (hidx + 1) * Dh]
            s = jnp.einsum('bqd,bkd->bqk',
                           qh.astype(jnp.bfloat16), kh.astype(jnp.bfloat16),
                           preferred_element_type=jnp.float32)           # (B,S,S) f32
            s = s + add_mask
            s_max = jnp.max(s, axis=-1, keepdims=True)
            p = jnp.exp(s - s_max)
            p = p * pl.reciprocal(jnp.sum(p, axis=-1, keepdims=True), approx=True)
            ctx_h = jnp.einsum('bqk,bkd->bqd',
                               p.astype(jnp.bfloat16), vh.astype(jnp.bfloat16),
                               preferred_element_type=jnp.float32)        # (B,S,Dh)
            # fold this head straight into the output projection (no concat)
            attn = attn + mm(ctx_h.reshape(B * S, Dh), wo_ref[l, hidx])
        attn = attn + bo_ref[l]
        # TODO(synk): HF hidden/attention dropouts (p=0.1) are identity in eval mode.
        h1 = layernorm(attn + x, ln1g_ref[l], ln1b_ref[l])

        inter = gelu(mm(h1, w1_ref[l]) + b1_ref[l])
        ffn_out = mm(inter, w2_ref[l]) + b2_ref[l]
        x = layernorm(ffn_out + h1, ln2g_ref[l], ln2b_ref[l])

    # ---- pooling head: mean/max over seq, then Linear(2H, 1) as a lane reduce ----
    o1 = x.reshape(B, S, H)
    apool = jnp.mean(o1, axis=1)                 # (B, H)  == torch.mean(o1, 1)
    mpool = jnp.max(o1, axis=1)                  # (B, H)  == torch.max(o1, 1)
    w = wout_ref[...]                            # (2, H): row 0 -> apool, row 1 -> mpool
    # N=1 output column would waste the MXU; VPU multiply + lane reduce instead.
    # TODO(synk): self.bert_drop (p=0.3) is identity in eval mode (no RNG applied).
    logits = (jnp.sum(apool * w[0:1, :] + mpool * w[1:2, :],
                      axis=-1, keepdims=True) + bout_ref[...])
    out_ref[...] = logits.astype(out_ref.dtype)


# --------------------------- model forward (glue) ------------------------------
def bert_pooled_classifier(params, ids, mask, token_type_ids):
    B, S = ids.shape
    # TODO(synk): at real-BERT sizes, move this gather into the kernel via
    # PrefetchScalarGridSpec + pl.Element row-gather and stream per-layer weights
    # (bf16, double-buffered) instead of the all-resident design used here.
    emb = (params["word_emb"][ids]
           + params["pos_emb"][:S][None, :, :]
           + params["type_emb"][token_type_ids]).astype(jnp.float32)   # (B, S, H)
    maskf = mask.astype(jnp.float32)

    operands = (emb, maskf,
                params["emb_ln_g"], params["emb_ln_b"],
                params["wqkv"], params["bqkv"], params["wo"], params["bo"],
                params["ln1_g"], params["ln1_b"],
                params["w1"], params["b1"], params["w2"], params["b2"],
                params["ln2_g"], params["ln2_b"],
                params["w_out"], params["b_out"])

    vmem_spec = pl.BlockSpec(memory_space=pltpu.MemorySpace.VMEM)
    return pl.pallas_call(
        _fused_bert_kernel,
        out_shape=jax.ShapeDtypeStruct((B, 1), jnp.float32),
        in_specs=[vmem_spec] * len(operands),
        out_specs=vmem_spec,
        compiler_params=pltpu.CompilerParams(vmem_limit_bytes=32 * 1024 * 1024),
    )(*operands)


# --------------------------- deterministic params -------------------------------
def init_params(key):
    keys = iter(jax.random.split(key, 16))

    def nrm(shape):
        return 0.02 * jax.random.normal(next(keys), shape, jnp.float32)

    L, H, F, Dh = N_LAYERS, HIDDEN, FFN, HEAD_DIM
    scale = 1.0 / math.sqrt(Dh)

    # fused QKV weights: columns [0:H]=Q, [H:2H]=K, [2H:3H]=V.
    # Fold the 1/sqrt(Dh) attention scale into the Q columns (and Q bias if nonzero).
    wqkv = nrm((L, H, 3 * H))
    wqkv = jnp.concatenate([wqkv[:, :, :H] * scale, wqkv[:, :, H:]], axis=-1)

    # attention output projection pre-split per head: (L, N_HEADS, Dh, H)
    wo = nrm((L, H, H)).reshape(L, N_HEADS, Dh, H)

    return {
        "word_emb": nrm((VOCAB, H)),
        "pos_emb": nrm((MAX_POS, H)),
        "type_emb": nrm((TYPE_VOCAB, H)),
        # biases / LN params pre-reshaped once (broadcast-ready); kept f32
        "emb_ln_g": jnp.ones((1, H), jnp.float32),
        "emb_ln_b": jnp.zeros((1, H), jnp.float32),
        # matmul weights stored bf16 (MXU-native); accumulation stays f32
        "wqkv": wqkv.astype(jnp.bfloat16),
        "bqkv": jnp.zeros((L, 1, 3 * H), jnp.float32),   # Q third would need *scale if nonzero
        "wo": wo.astype(jnp.bfloat16),
        "bo": jnp.zeros((L, 1, H), jnp.float32),
        "ln1_g": jnp.ones((L, 1, H), jnp.float32),
        "ln1_b": jnp.zeros((L, 1, H), jnp.float32),
        "w1": nrm((L, H, F)).astype(jnp.bfloat16),
        "b1": jnp.zeros((L, 1, F), jnp.float32),
        "w2": nrm((L, F, H)).astype(jnp.bfloat16),
        "b2": jnp.zeros((L, 1, H), jnp.float32),
        "ln2_g": jnp.ones((L, 1, H), jnp.float32),
        "ln2_b": jnp.zeros((L, 1, H), jnp.float32),
        # Linear(2H, 1): row 0 = mean-pool weights, row 1 = max-pool weights (f32, VPU path)
        "w_out": nrm((2, H)),
        "b_out": jnp.zeros((1, 1), jnp.float32),
    }


if __name__ == "__main__":
    key = jax.random.PRNGKey(0)
    pkey, ikey = jax.random.split(key)
    params = init_params(pkey)

    B, S = 2, 8
    ids = jax.random.randint(ikey, (B, S), 0, VOCAB, dtype=jnp.int32)
    mask = jnp.ones((B, S), jnp.int32).at[1, -2:].set(0)       # some padding
    token_type_ids = jnp.zeros((B, S), jnp.int32).at[:, S // 2:].set(1)

    logits = jax.jit(bert_pooled_classifier)(params, ids, mask, token_type_ids)
    jax.block_until_ready(logits)
    assert logits.shape == (B, 1) and logits.dtype == jnp.float32
    print("KERNEL_OK")
</pallas_src>

<mosaic_0001>
module attributes {stable_mosaic.version = 11 : i64} {
  func.func @_fused_bert_kernel(%arg0: memref<2x8x32xf32, #tpu.memory_space<vmem>>, %arg1: memref<2x8xf32, #tpu.memory_space<vmem>>, %arg2: memref<1x32xf32, #tpu.memory_space<vmem>>, %arg3: memref<1x32xf32, #tpu.memory_space<vmem>>, %arg4: memref<2x32x96xbf16, #tpu.memory_space<vmem>>, %arg5: memref<2x1x96xf32, #tpu.memory_space<vmem>>, %arg6: memref<2x2x16x32xbf16, #tpu.memory_space<vmem>>, %arg7: memref<2x1x32xf32, #tpu.memory_space<vmem>>, %arg8: memref<2x1x32xf32, #tpu.memory_space<vmem>>, %arg9: memref<2x1x32xf32, #tpu.memory_space<vmem>>, %arg10: memref<2x32x64xbf16, #tpu.memory_space<vmem>>, %arg11: memref<2x1x64xf32, #tpu.memory_space<vmem>>, %arg12: memref<2x64x32xbf16, #tpu.memory_space<vmem>>, %arg13: memref<2x1x32xf32, #tpu.memory_space<vmem>>, %arg14: memref<2x1x32xf32, #tpu.memory_space<vmem>>, %arg15: memref<2x1x32xf32, #tpu.memory_space<vmem>>, %arg16: memref<2x32xf32, #tpu.memory_space<vmem>>, %arg17: memref<1x1xf32, #tpu.memory_space<vmem>>, %arg18: memref<2x1xf32, #tpu.memory_space<vmem>>) attributes {dimension_semantics = [], scalar_prefetch = 0 : i64, scratch_operands = 0 : i64, tpu.core_type = #tpu.core_type<tc>} {
    %c0 = arith.constant 0 : index
    %c0_0 = arith.constant 0 : index
    %c0_1 = arith.constant 0 : index
    %0 = vector.load %arg0[%c0, %c0_0, %c0_1] : memref<2x8x32xf32, #tpu.memory_space<vmem>>, vector<2x8x32xf32>
    %1 = vector.shape_cast %0 : vector<2x8x32xf32> to vector<16x32xf32>
    %c0_2 = arith.constant 0 : index
    %c0_3 = arith.constant 0 : index
    %2 = vector.load %arg2[%c0_2, %c0_3] : memref<1x32xf32, #tpu.memory_space<vmem>>, vector<1x32xf32>
    %c0_4 = arith.constant 0 : index
    %c0_5 = arith.constant 0 : index
    %3 = vector.load %arg3[%c0_4, %c0_5] : memref<1x32xf32, #tpu.memory_space<vmem>>, vector<1x32xf32>
    %cst = arith.constant dense<0.000000e+00> : vector<16xf32>
    %4 = vector.multi_reduction <add>, %1, %cst [1] : vector<16x32xf32> to vector<16xf32>
    %5 = vector.shape_cast %4 : vector<16xf32> to vector<16x1xf32>
    %cst_6 = arith.constant 3.200000e+01 : f32
    %6 = vector.broadcast %cst_6 : f32 to vector<16x1xf32>
    %7 = arith.divf %5, %6 : vector<16x1xf32>
    %8 = vector.broadcast %7 : vector<16x1xf32> to vector<16x32xf32>
    %9 = arith.subf %1, %8 : vector<16x32xf32>
    %10 = vector.broadcast %7 : vector<16x1xf32> to vector<16x32xf32>
    %11 = arith.subf %1, %10 : vector<16x32xf32>
    %12 = arith.mulf %9, %11 : vector<16x32xf32>
    %cst_7 = arith.constant dense<0.000000e+00> : vector<16xf32>
    %13 = vector.multi_reduction <add>, %12, %cst_7 [1] : vector<16x32xf32> to vector<16xf32>
    %14 = vector.shape_cast %13 : vector<16xf32> to vector<16x1xf32>
    %cst_8 = arith.constant 3.200000e+01 : f32
    %15 = vector.broadcast %cst_8 : f32 to vector<16x1xf32>
    %16 = arith.divf %14, %15 : vector<16x1xf32>
    %17 = vector.broadcast %7 : vector<16x1xf32> to vector<16x32xf32>
    %18 = arith.subf %1, %17 : vector<16x32xf32>
    %cst_9 = arith.constant 9.99999996E-13 : f32
    %19 = vector.broadcast %cst_9 : f32 to vector<16x1xf32>
    %20 = arith.addf %16, %19 : vector<16x1xf32>
    %21 = math.rsqrt %20 : vector<16x1xf32>
    %22 = vector.broadcast %21 : vector<16x1xf32> to vector<16x32xf32>
    %23 = arith.mulf %18, %22 : vector<16x32xf32>
    %24 = vector.broadcast %2 : vector<1x32xf32> to vector<16x32xf32>
    %25 = arith.mulf %23, %24 : vector<16x32xf32>
    %26 = vector.broadcast %3 : vector<1x32xf32> to vector<16x32xf32>
    %27 = arith.addf %25, %26 : vector<16x32xf32>
    %c0_10 = arith.constant 0 : index
    %c0_11 = arith.constant 0 : index
    %28 = vector.load %arg1[%c0_10, %c0_11] : memref<2x8xf32, #tpu.memory_space<vmem>>, vector<2x8xf32>
    %cst_12 = arith.constant 1.000000e+00 : f32
    %29 = vector.broadcast %cst_12 : f32 to vector<2x8xf32>
    %30 = arith.subf %29, %28 : vector<2x8xf32>
    %cst_13 = arith.constant -1.000000e+09 : f32
    %31 = vector.broadcast %cst_13 : f32 to vector<2x8xf32>
    %32 = arith.mulf %30, %31 : vector<2x8xf32>
    %33 = vector.shape_cast %32 : vector<2x8xf32> to vector<2x1x8xf32>
    %34 = vector.shape_cast %33 : vector<2x1x8xf32> to vector<2x1x8xf32>
    %35 = vector.broadcast %34 : vector<2x1x8xf32> to vector<2x8x8xf32>
    %c0_14 = arith.constant 0 : index
    %c0_15 = arith.constant 0 : index
    %c0_16 = arith.constant 0 : index
    %36 = vector.load %arg4[%c0_14, %c0_15, %c0_16] : memref<2x32x96xbf16, #tpu.memory_space<vmem>>, vector<1x32x96xbf16>
    %37 = vector.shape_cast %36 : vector<1x32x96xbf16> to vector<32x96xbf16>
    %38 = arith.truncf %27 : vector<16x32xf32> to vector<16x32xbf16>
    %cst_17 = arith.constant dense<0.000000e+00> : vector<16x96xf32>
    %39 = tpu.matmul %38, %37, %cst_17 {dimension_numbers = #tpu.dot_dimension_numbers<[1], [0], [0], [1], [0, 0, 1, 1], [], []>} : vector<16x32xbf16>, vector<32x96xbf16>, vector<16x96xf32> -> vector<16x96xf32>
    %c0_18 = arith.constant 0 : index
    %c0_19 = arith.constant 0 : index
    %c0_20 = arith.constant 0 : index
    %40 = vector.load %arg5[%c0_18, %c0_19, %c0_20] : memref<2x1x96xf32, #tpu.memory_space<vmem>>, vector<1x1x96xf32>
    %41 = vector.shape_cast %40 : vector<1x1x96xf32> to vector<1x96xf32>
    %42 = vector.broadcast %41 : vector<1x96xf32> to vector<16x96xf32>
    %43 = arith.addf %39, %42 : vector<16x96xf32>
    %44 = vector.shape_cast %43 : vector<16x96xf32> to vector<2x8x96xf32>
    %cst_21 = arith.constant 0.000000e+00 : f32
    %45 = vector.broadcast %cst_21 : f32 to vector<16x32xf32>
    %46 = vector.extract_strided_slice %44 {offsets = [0, 0, 0], sizes = [2, 8, 16], strides = [1, 1, 1]} : vector<2x8x96xf32> to vector<2x8x16xf32>
    %47 = vector.extract_strided_slice %44 {offsets = [0, 0, 32], sizes = [2, 8, 16], strides = [1, 1, 1]} : vector<2x8x96xf32> to vector<2x8x16xf32>
    %48 = vector.extract_strided_slice %44 {offsets = [0, 0, 64], sizes = [2, 8, 16], strides = [1, 1, 1]} : vector<2x8x96xf32> to vector<2x8x16xf32>
    %49 = arith.truncf %46 : vector<2x8x16xf32> to vector<2x8x16xbf16>
    %50 = arith.truncf %47 : vector<2x8x16xf32> to vector<2x8x16xbf16>
    "tpu.trace_start"() <{level = 10 : i32, message = "bqd,bkd->bqk"}> : () -> ()
    %cst_22 = arith.constant dense<0.000000e+00> : vector<2x8x8xf32>
    %51 = tpu.matmul %49, %50, %cst_22 {dimension_numbers = #tpu.dot_dimension_numbers<[2], [2], [1], [1], [0, 0, 0, 1, 1, 1], [0], [0]>} : vector<2x8x16xbf16>, vector<2x8x16xbf16>, vector<2x8x8xf32> -> vector<2x8x8xf32>
    "tpu.trace_stop"() : () -> ()
    %52 = arith.addf %51, %35 : vector<2x8x8xf32>
    %cst_23 = arith.constant dense<0xFF800000> : vector<2x8xf32>
    %53 = vector.multi_reduction <maximumf>, %52, %cst_23 [2] : vector<2x8x8xf32> to vector<2x8xf32>
    %54 = vector.shape_cast %53 : vector<2x8xf32> to vector<2x8x1xf32>
    %55 = vector.broadcast %54 : vector<2x8x1xf32> to vector<2x8x8xf32>
    %56 = arith.subf %52, %55 : vector<2x8x8xf32>
    %57 = math.exp %56 : vector<2x8x8xf32>
    %cst_24 = arith.constant dense<0.000000e+00> : vector<2x8xf32>
    %58 = vector.multi_reduction <add>, %57, %cst_24 [2] : vector<2x8x8xf32> to vector<2x8xf32>
    %59 = vector.shape_cast %58 : vector<2x8xf32> to vector<2x8x1xf32>
    %60 = tpu.reciprocal %59 {approx = true} : vector<2x8x1xf32> -> vector<2x8x1xf32>
    %61 = vector.broadcast %60 : vector<2x8x1xf32> to vector<2x8x8xf32>
    %62 = arith.mulf %57, %61 : vector<2x8x8xf32>
    %63 = arith.truncf %62 : vector<2x8x8xf32> to vector<2x8x8xbf16>
    %64 = arith.truncf %48 : vector<2x8x16xf32> to vector<2x8x16xbf16>
    "tpu.trace_start"() <{level = 10 : i32, message = "bqk,bkd->bqd"}> : () -> ()
    %cst_25 = arith.constant dense<0.000000e+00> : vector<2x8x16xf32>
    %65 = tpu.matmul %63, %64, %cst_25 {dimension_numbers = #tpu.dot_dimension_numbers<[2], [1], [1], [2], [0, 0, 0, 1, 1, 2], [0], [0]>} : vector<2x8x8xbf16>, vector<2x8x16xbf16>, vector<2x8x16xf32> -> vector<2x8x16xf32>
    "tpu.trace_stop"() : () -> ()
    %66 = vector.shape_cast %65 : vector<2x8x16xf32> to vector<16x16xf32>
    %c0_26 = arith.constant 0 : index
    %c0_27 = arith.constant 0 : index
    %c0_28 = arith.constant 0 : index
    %c0_29 = arith.constant 0 : index
    %67 = vector.load %arg6[%c0_26, %c0_27, %c0_28, %c0_29] : memref<2x2x16x32xbf16, #tpu.memory_space<vmem>>, vector<1x1x16x32xbf16>
    %68 = vector.shape_cast %67 : vector<1x1x16x32xbf16> to vector<16x32xbf16>
    %69 = arith.truncf %66 : vector<16x16xf32> to vector<16x16xbf16>
    %cst_30 = arith.constant dense<0.000000e+00> : vector<16x32xf32>
    %70 = tpu.matmul %69, %68, %cst_30 {dimension_numbers = #tpu.dot_dimension_numbers<[1], [0], [0], [1], [0, 0, 1, 1], [], []>} : vector<16x16xbf16>, vector<16x32xbf16>, vector<16x32xf32> -> vector<16x32xf32>
    %71 = arith.addf %45, %70 : vector<16x32xf32>
    %72 = vector.extract_strided_slice %44 {offsets = [0, 0, 16], sizes = [2, 8, 16], strides = [1, 1, 1]} : vector<2x8x96xf32> to vector<2x8x16xf32>
    %73 = vector.extract_strided_slice %44 {offsets = [0, 0, 48], sizes = [2, 8, 16], strides = [1, 1, 1]} : vector<2x8x96xf32> to vector<2x8x16xf32>
    %74 = vector.extract_strided_slice %44 {offsets = [0, 0, 80], sizes = [2, 8, 16], strides = [1, 1, 1]} : vector<2x8x96xf32> to vector<2x8x16xf32>
    %75 = arith.truncf %72 : vector<2x8x16xf32> to vector<2x8x16xbf16>
    %76 = arith.truncf %73 : vector<2x8x16xf32> to vector<2x8x16xbf16>
    "tpu.trace_start"() <{level = 10 : i32, message = "bqd,bkd->bqk"}> : () -> ()
    %cst_31 = arith.constant dense<0.000000e+00> : vector<2x8x8xf32>
    %77 = tpu.matmul %75, %76, %cst_31 {dimension_numbers = #tpu.dot_dimension_numbers<[2], [2], [1], [1], [0, 0, 0, 1, 1, 1], [0], [0]>} : vector<2x8x16xbf16>, vector<2x8x16xbf16>, vector<2x8x8xf32> -> vector<2x8x8xf32>
    "tpu.trace_stop"() : () -> ()
    %78 = arith.addf %77, %35 : vector<2x8x8xf32>
    %cst_32 = arith.constant dense<0xFF800000> : vector<2x8xf32>
    %79 = vector.multi_reduction <maximumf>, %78, %cst_32 [2] : vector<2x8x8xf32> to vector<2x8xf32>
    %80 = vector.shape_cast %79 : vector<2x8xf32> to vector<2x8x1xf32>
    %81 = vector.broadcast %80 : vector<2x8x1xf32> to vector<2x8x8xf32>
    %82 = arith.subf %78, %81 : vector<2x8x8xf32>
    %83 = math.exp %82 : vector<2x8x8xf32>
    %cst_33 = arith.constant dense<0.000000e+00> : vector<2x8xf32>
    %84 = vector.multi_reduction <add>, %83, %cst_33 [2] : vector<2x8x8xf32> to vector<2x8xf32>
    %85 = vector.shape_cast %84 : vector<2x8xf32> to vector<2x8x1xf32>
    %86 = tpu.reciprocal %85 {approx = true} : vector<2x8x1xf32> -> vector<2x8x1xf32>
    %87 = vector.broadcast %86 : vector<2x8x1xf32> to vector<2x8x8xf32>
    %88 = arith.mulf %83, %87 : vector<2x8x8xf32>
    %89 = arith.truncf %88 : vector<2x8x8xf32> to vector<2x8x8xbf16>
    %90 = arith.truncf %74 : vector<2x8x16xf32> to vector<2x8x16xbf16>
    "tpu.trace_start"() <{level = 10 : i32, message = "bqk,bkd->bqd"}> : () -> ()
    %cst_34 = arith.constant dense<0.000000e+00> : vector<2x8x16xf32>
    %91 = tpu.matmul %89, %90, %cst_34 {dimension_numbers = #tpu.dot_dimension_numbers<[2], [1], [1], [2], [0, 0, 0, 1, 1, 2], [0], [0]>} : vector<2x8x8xbf16>, vector<2x8x16xbf16>, vector<2x8x16xf32> -> vector<2x8x16xf32>
    "tpu.trace_stop"() : () -> ()
    %92 = vector.shape_cast %91 : vector<2x8x16xf32> to vector<16x16xf32>
    %c0_35 = arith.constant 0 : index
    %c1 = arith.constant 1 : index
    %c0_36 = arith.constant 0 : index
    %c0_37 = arith.constant 0 : index
    %93 = vector.load %arg6[%c0_35, %c1, %c0_36, %c0_37] : memref<2x2x16x32xbf16, #tpu.memory_space<vmem>>, vector<1x1x16x32xbf16>
    %94 = vector.shape_cast %93 : vector<1x1x16x32xbf16> to vector<16x32xbf16>
    %95 = arith.truncf %92 : vector<16x16xf32> to vector<16x16xbf16>
    %cst_38 = arith.constant dense<0.000000e+00> : vector<16x32xf32>
    %96 = tpu.matmul %95, %94, %cst_38 {dimension_numbers = #tpu.dot_dimension_numbers<[1], [0], [0], [1], [0, 0, 1, 1], [], []>} : vector<16x16xbf16>, vector<16x32xbf16>, vector<16x32xf32> -> vector<16x32xf32>
    %97 = arith.addf %71, %96 : vector<16x32xf32>
    %c0_39 = arith.constant 0 : index
    %c0_40 = arith.constant 0 : index
    %c0_41 = arith.constant 0 : index
    %98 = vector.load %arg7[%c0_39, %c0_40, %c0_41] : memref<2x1x32xf32, #tpu.memory_space<vmem>>, vector<1x1x32xf32>
    %99 = vector.shape_cast %98 : vector<1x1x32xf32> to vector<1x32xf32>
    %100 = vector.broadcast %99 : vector<1x32xf32> to vector<16x32xf32>
    %101 = arith.addf %97, %100 : vector<16x32xf32>
    %102 = arith.addf %101, %27 : vector<16x32xf32>
    %c0_42 = arith.constant 0 : index
    %c0_43 = arith.constant 0 : index
    %c0_44 = arith.constant 0 : index
    %103 = vector.load %arg8[%c0_42, %c0_43, %c0_44] : memref<2x1x32xf32, #tpu.memory_space<vmem>>, vector<1x1x32xf32>
    %104 = vector.shape_cast %103 : vector<1x1x32xf32> to vector<1x32xf32>
    %c0_45 = arith.constant 0 : index
    %c0_46 = arith.constant 0 : index
    %c0_47 = arith.constant 0 : index
    %105 = vector.load %arg9[%c0_45, %c0_46, %c0_47] : memref<2x1x32xf32, #tpu.memory_space<vmem>>, vector<1x1x32xf32>
    %106 = vector.shape_cast %105 : vector<1x1x32xf32> to vector<1x32xf32>
    %cst_48 = arith.constant dense<0.000000e+00> : vector<16xf32>
    %107 = vector.multi_reduction <add>, %102, %cst_48 [1] : vector<16x32xf32> to vector<16xf32>
    %108 = vector.shape_cast %107 : vector<16xf32> to vector<16x1xf32>
    %cst_49 = arith.constant 3.200000e+01 : f32
    %109 = vector.broadcast %cst_49 : f32 to vector<16x1xf32>
    %110 = arith.divf %108, %109 : vector<16x1xf32>
    %111 = vector.broadcast %110 : vector<16x1xf32> to vector<16x32xf32>
    %112 = arith.subf %102, %111 : vector<16x32xf32>
    %113 = vector.broadcast %110 : vector<16x1xf32> to vector<16x32xf32>
    %114 = arith.subf %102, %113 : vector<16x32xf32>
    %115 = arith.mulf %112, %114 : vector<16x32xf32>
    %cst_50 = arith.constant dense<0.000000e+00> : vector<16xf32>
    %116 = vector.multi_reduction <add>, %115, %cst_50 [1] : vector<16x32xf32> to vector<16xf32>
    %117 = vector.shape_cast %116 : vector<16xf32> to vector<16x1xf32>
    %cst_51 = arith.constant 3.200000e+01 : f32
    %118 = vector.broadcast %cst_51 : f32 to vector<16x1xf32>
    %119 = arith.divf %117, %118 : vector<16x1xf32>
    %120 = vector.broadcast %110 : vector<16x1xf32> to vector<16x32xf32>
    %121 = arith.subf %102, %120 : vector<16x32xf32>
    %cst_52 = arith.constant 9.99999996E-13 : f32
    %122 = vector.broadcast %cst_52 : f32 to vector<16x1xf32>
    %123 = arith.addf %119, %122 : vector<16x1xf32>
    %124 = math.rsqrt %123 : vector<16x1xf32>
    %125 = vector.broadcast %124 : vector<16x1xf32> to vector<16x32xf32>
    %126 = arith.mulf %121, %125 : vector<16x32xf32>
    %127 = vector.broadcast %104 : vector<1x32xf32> to vector<16x32xf32>
    %128 = arith.mulf %126, %127 : vector<16x32xf32>
    %129 = vector.broadcast %106 : vector<1x32xf32> to vector<16x32xf32>
    %130 = arith.addf %128, %129 : vector<16x32xf32>
    %c0_53 = arith.constant 0 : index
    %c0_54 = arith.constant 0 : index
    %c0_55 = arith.constant 0 : index
    %131 = vector.load %arg10[%c0_53, %c0_54, %c0_55] : memref<2x32x64xbf16, #tpu.memory_space<vmem>>, vector<1x32x64xbf16>
    %132 = vector.shape_cast %131 : vector<1x32x64xbf16> to vector<32x64xbf16>
    %133 = arith.truncf %130 : vector<16x32xf32> to vector<16x32xbf16>
    %cst_56 = arith.constant dense<0.000000e+00> : vector<16x64xf32>
    %134 = tpu.matmul %133, %132, %cst_56 {dimension_numbers = #tpu.dot_dimension_numbers<[1], [0], [0], [1], [0, 0, 1, 1], [], []>} : vector<16x32xbf16>, vector<32x64xbf16>, vector<16x64xf32> -> vector<16x64xf32>
    %c0_57 = arith.constant 0 : index
    %c0_58 = arith.constant 0 : index
    %c0_59 = arith.constant 0 : index
    %135 = vector.load %arg11[%c0_57, %c0_58, %c0_59] : memref<2x1x64xf32, #tpu.memory_space<vmem>>, vector<1x1x64xf32>
    %136 = vector.shape_cast %135 : vector<1x1x64xf32> to vector<1x64xf32>
    %137 = vector.broadcast %136 : vector<1x64xf32> to vector<16x64xf32>
    %138 = arith.addf %134, %137 : vector<16x64xf32>
    %cst_60 = arith.constant 5.000000e-01 : f32
    %139 = vector.broadcast %cst_60 : f32 to vector<16x64xf32>
    %140 = arith.mulf %139, %138 : vector<16x64xf32>
    %cst_61 = arith.constant 4.471500e-02 : f32
    %141 = vector.broadcast %cst_61 : f32 to vector<16x64xf32>
    %142 = arith.mulf %141, %138 : vector<16x64xf32>
    %143 = arith.mulf %142, %138 : vector<16x64xf32>
    %144 = arith.mulf %143, %138 : vector<16x64xf32>
    %145 = arith.addf %138, %144 : vector<16x64xf32>
    %cst_62 = arith.constant 0.797884583 : f32
    %146 = vector.broadcast %cst_62 : f32 to vector<16x64xf32>
    %147 = arith.mulf %146, %145 : vector<16x64xf32>
    %148 = math.tanh %147 : vector<16x64xf32>
    %cst_63 = arith.constant 1.000000e+00 : f32
    %149 = vector.broadcast %cst_63 : f32 to vector<16x64xf32>
    %150 = arith.addf %149, %148 : vector<16x64xf32>
    %151 = arith.mulf %140, %150 : vector<16x64xf32>
    %c0_64 = arith.constant 0 : index
    %c0_65 = arith.constant 0 : index
    %c0_66 = arith.constant 0 : index
    %152 = vector.load %arg12[%c0_64, %c0_65, %c0_66] : memref<2x64x32xbf16, #tpu.memory_space<vmem>>, vector<1x64x32xbf16>
    %153 = vector.shape_cast %152 : vector<1x64x32xbf16> to vector<64x32xbf16>
    %154 = arith.truncf %151 : vector<16x64xf32> to vector<16x64xbf16>
    %cst_67 = arith.constant dense<0.000000e+00> : vector<16x32xf32>
    %155 = tpu.matmul %154, %153, %cst_67 {dimension_numbers = #tpu.dot_dimension_numbers<[1], [0], [0], [1], [0, 0, 1, 1], [], []>} : vector<16x64xbf16>, vector<64x32xbf16>, vector<16x32xf32> -> vector<16x32xf32>
    %c0_68 = arith.constant 0 : index
    %c0_69 = arith.constant 0 : index
    %c0_70 = arith.constant 0 : index
    %156 = vector.load %arg13[%c0_68, %c0_69, %c0_70] : memref<2x1x32xf32, #tpu.memory_space<vmem>>, vector<1x1x32xf32>
    %157 = vector.shape_cast %156 : vector<1x1x32xf32> to vector<1x32xf32>
    %158 = vector.broadcast %157 : vector<1x32xf32> to vector<16x32xf32>
    %159 = arith.addf %155, %158 : vector<16x32xf32>
    %160 = arith.addf %159, %130 : vector<16x32xf32>
    %c0_71 = arith.constant 0 : index
    %c0_72 = arith.constant 0 : index
    %c0_73 = arith.constant 0 : index
    %161 = vector.load %arg14[%c0_71, %c0_72, %c0_73] : memref<2x1x32xf32, #tpu.memory_space<vmem>>, vector<1x1x32xf32>
    %162 = vector.shape_cast %161 : vector<1x1x32xf32> to vector<1x32xf32>
    %c0_74 = arith.constant 0 : index
    %c0_75 = arith.constant 0 : index
    %c0_76 = arith.constant 0 : index
    %163 = vector.load %arg15[%c0_74, %c0_75, %c0_76] : memref<2x1x32xf32, #tpu.memory_space<vmem>>, vector<1x1x32xf32>
    %164 = vector.shape_cast %163 : vector<1x1x32xf32> to vector<1x32xf32>
    %cst_77 = arith.constant dense<0.000000e+00> : vector<16xf32>
    %165 = vector.multi_reduction <add>, %160, %cst_77 [1] : vector<16x32xf32> to vector<16xf32>
    %166 = vector.shape_cast %165 : vector<16xf32> to vector<16x1xf32>
    %cst_78 = arith.constant 3.200000e+01 : f32
    %167 = vector.broadcast %cst_78 : f32 to vector<16x1xf32>
    %168 = arith.divf %166, %167 : vector<16x1xf32>
    %169 = vector.broadcast %168 : vector<16x1xf32> to vector<16x32xf32>
    %170 = arith.subf %160, %169 : vector<16x32xf32>
    %171 = vector.broadcast %168 : vector<16x1xf32> to vector<16x32xf32>
    %172 = arith.subf %160, %171 : vector<16x32xf32>
    %173 = arith.mulf %170, %172 : vector<16x32xf32>
    %cst_79 = arith.constant dense<0.000000e+00> : vector<16xf32>
    %174 = vector.multi_reduction <add>, %173, %cst_79 [1] : vector<16x32xf32> to vector<16xf32>
    %175 = vector.shape_cast %174 : vector<16xf32> to vector<16x1xf32>
    %cst_80 = arith.constant 3.200000e+01 : f32
    %176 = vector.broadcast %cst_80 : f32 to vector<16x1xf32>
    %177 = arith.divf %175, %176 : vector<16x1xf32>
    %178 = vector.broadcast %168 : vector<16x1xf32> to vector<16x32xf32>
    %179 = arith.subf %160, %178 : vector<16x32xf32>
    %cst_81 = arith.constant 9.99999996E-13 : f32
    %180 = vector.broadcast %cst_81 : f32 to vector<16x1xf32>
    %181 = arith.addf %177, %180 : vector<16x1xf32>
    %182 = math.rsqrt %181 : vector<16x1xf32>
    %183 = vector.broadcast %182 : vector<16x1xf32> to vector<16x32xf32>
    %184 = arith.mulf %179, %183 : vector<16x32xf32>
    %185 = vector.broadcast %162 : vector<1x32xf32> to vector<16x32xf32>
    %186 = arith.mulf %184, %185 : vector<16x32xf32>
    %187 = vector.broadcast %164 : vector<1x32xf32> to vector<16x32xf32>
    %188 = arith.addf %186, %187 : vector<16x32xf32>
    %c1_82 = arith.constant 1 : index
    %c0_83 = arith.constant 0 : index
    %c0_84 = arith.constant 0 : index
    %189 = vector.load %arg4[%c1_82, %c0_83, %c0_84] : memref<2x32x96xbf16, #tpu.memory_space<vmem>>, vector<1x32x96xbf16>
    %190 = vector.shape_cast %189 : vector<1x32x96xbf16> to vector<32x96xbf16>
    %191 = arith.truncf %188 : vector<16x32xf32> to vector<16x32xbf16>
    %cst_85 = arith.constant dense<0.000000e+00> : vector<16x96xf32>
    %192 = tpu.matmul %191, %190, %cst_85 {dimension_numbers = #tpu.dot_dimension_numbers<[1], [0], [0], [1], [0, 0, 1, 1], [], []>} : vector<16x32xbf16>, vector<32x96xbf16>, vector<16x96xf32> -> vector<16x96xf32>
    %c1_86 = arith.constant 1 : index
    %c0_87 = arith.constant 0 : index
    %c0_88 = arith.constant 0 : index
    %193 = vector.load %arg5[%c1_86, %c0_87, %c0_88] : memref<2x1x96xf32, #tpu.memory_space<vmem>>, vector<1x1x96xf32>
    %194 = vector.shape_cast %193 : vector<1x1x96xf32> to vector<1x96xf32>
    %195 = vector.broadcast %194 : vector<1x96xf32> to vector<16x96xf32>
    %196 = arith.addf %192, %195 : vector<16x96xf32>
    %197 = vector.shape_cast %196 : vector<16x96xf32> to vector<2x8x96xf32>
    %cst_89 = arith.constant 0.000000e+00 : f32
    %198 = vector.broadcast %cst_89 : f32 to vector<16x32xf32>
    %199 = vector.extract_strided_slice %197 {offsets = [0, 0, 0], sizes = [2, 8, 16], strides = [1, 1, 1]} : vector<2x8x96xf32> to vector<2x8x16xf32>
    %200 = vector.extract_strided_slice %197 {offsets = [0, 0, 32], sizes = [2, 8, 16], strides = [1, 1, 1]} : vector<2x8x96xf32> to vector<2x8x16xf32>
    %201 = vector.extract_strided_slice %197 {offsets = [0, 0, 64], sizes = [2, 8, 16], strides = [1, 1, 1]} : vector<2x8x96xf32> to vector<2x8x16xf32>
    %202 = arith.truncf %199 : vector<2x8x16xf32> to vector<2x8x16xbf16>
    %203 = arith.truncf %200 : vector<2x8x16xf32> to vector<2x8x16xbf16>
    "tpu.trace_start"() <{level = 10 : i32, message = "bqd,bkd->bqk"}> : () -> ()
    %cst_90 = arith.constant dense<0.000000e+00> : vector<2x8x8xf32>
    %204 = tpu.matmul %202, %203, %cst_90 {dimension_numbers = #tpu.dot_dimension_numbers<[2], [2], [1], [1], [0, 0, 0, 1, 1, 1], [0], [0]>} : vector<2x8x16xbf16>, vector<2x8x16xbf16>, vector<2x8x8xf32> -> vector<2x8x8xf32>
    "tpu.trace_stop"() : () -> ()
    %205 = arith.addf %204, %35 : vector<2x8x8xf32>
    %cst_91 = arith.constant dense<0xFF800000> : vector<2x8xf32>
    %206 = vector.multi_reduction <maximumf>, %205, %cst_91 [2] : vector<2x8x8xf32> to vector<2x8xf32>
    %207 = vector.shape_cast %206 : vector<2x8xf32> to vector<2x8x1xf32>
    %208 = vector.broadcast %207 : vector<2x8x1xf32> to vector<2x8x8xf32>
    %209 = arith.subf %205, %208 : vector<2x8x8xf32>
    %210 = math.exp %209 : vector<2x8x8xf32>
    %cst_92 = arith.constant dense<0.000000e+00> : vector<2x8xf32>
    %211 = vector.multi_reduction <add>, %210, %cst_92 [2] : vector<2x8x8xf32> to vector<2x8xf32>
    %212 = vector.shape_cast %211 : vector<2x8xf32> to vector<2x8x1xf32>
    %213 = tpu.reciprocal %212 {approx = true} : vector<2x8x1xf32> -> vector<2x8x1xf32>
    %214 = vector.broadcast %213 : vector<2x8x1xf32> to vector<2x8x8xf32>
    %215 = arith.mulf %210, %214 : vector<2x8x8xf32>
    %216 = arith.truncf %215 : vector<2x8x8xf32> to vector<2x8x8xbf16>
    %217 = arith.truncf %201 : vector<2x8x16xf32> to vector<2x8x16xbf16>
    "tpu.trace_start"() <{level = 10 : i32, message = "bqk,bkd->bqd"}> : () -> ()
    %cst_93 = arith.constant dense<0.000000e+00> : vector<2x8x16xf32>
    %218 = tpu.matmul %216, %217, %cst_93 {dimension_numbers = #tpu.dot_dimension_numbers<[2], [1], [1], [2], [0, 0, 0, 1, 1, 2], [0], [0]>} : vector<2x8x8xbf16>, vector<2x8x16xbf16>, vector<2x8x16xf32> -> vector<2x8x16xf32>
    "tpu.trace_stop"() : () -> ()
    %219 = vector.shape_cast %218 : vector<2x8x16xf32> to vector<16x16xf32>
    %c1_94 = arith.constant 1 : index
    %c0_95 = arith.constant 0 : index
    %c0_96 = arith.constant 0 : index
    %c0_97 = arith.constant 0 : index
    %220 = vector.load %arg6[%c1_94, %c0_95, %c0_96, %c0_97] : memref<2x2x16x32xbf16, #tpu.memory_space<vmem>>, vector<1x1x16x32xbf16>
    %221 = vector.shape_cast %220 : vector<1x1x16x32xbf16> to vector<16x32xbf16>
    %222 = arith.truncf %219 : vector<16x16xf32> to vector<16x16xbf16>
    %cst_98 = arith.constant dense<0.000000e+00> : vector<16x32xf32>
    %223 = tpu.matmul %222, %221, %cst_98 {dimension_numbers = #tpu.dot_dimension_numbers<[1], [0], [0], [1], [0, 0, 1, 1], [], []>} : vector<16x16xbf16>, vector<16x32xbf16>, vector<16x32xf32> -> vector<16x32xf32>
    %224 = arith.addf %198, %223 : vector<16x32xf32>
    %225 = vector.extract_strided_slice %197 {offsets = [0, 0, 16], sizes = [2, 8, 16], strides = [1, 1, 1]} : vector<2x8x96xf32> to vector<2x8x16xf32>
    %226 = vector.extract_strided_slice %197 {offsets = [0, 0, 48], sizes = [2, 8, 16], strides = [1, 1, 1]} : vector<2x8x96xf32> to vector<2x8x16xf32>
    %227 = vector.extract_strided_slice %197 {offsets = [0, 0, 80], sizes = [2, 8, 16], strides = [1, 1, 1]} : vector<2x8x96xf32> to vector<2x8x16xf32>
    %228 = arith.truncf %225 : vector<2x8x16xf32> to vector<2x8x16xbf16>
    %229 = arith.truncf %226 : vector<2x8x16xf32> to vector<2x8x16xbf16>
    "tpu.trace_start"() <{level = 10 : i32, message = "bqd,bkd->bqk"}> : () -> ()
    %cst_99 = arith.constant dense<0.000000e+00> : vector<2x8x8xf32>
    %230 = tpu.matmul %228, %229, %cst_99 {dimension_numbers = #tpu.dot_dimension_numbers<[2], [2], [1], [1], [0, 0, 0, 1, 1, 1], [0], [0]>} : vector<2x8x16xbf16>, vector<2x8x16xbf16>, vector<2x8x8xf32> -> vector<2x8x8xf32>
    "tpu.trace_stop"() : () -> ()
    %231 = arith.addf %230, %35 : vector<2x8x8xf32>
    %cst_100 = arith.constant dense<0xFF800000> : vector<2x8xf32>
    %232 = vector.multi_reduction <maximumf>, %231, %cst_100 [2] : vector<2x8x8xf32> to vector<2x8xf32>
    %233 = vector.shape_cast %232 : vector<2x8xf32> to vector<2x8x1xf32>
    %234 = vector.broadcast %233 : vector<2x8x1xf32> to vector<2x8x8xf32>
    %235 = arith.subf %231, %234 : vector<2x8x8xf32>
    %236 = math.exp %235 : vector<2x8x8xf32>
    %cst_101 = arith.constant dense<0.000000e+00> : vector<2x8xf32>
    %237 = vector.multi_reduction <add>, %236, %cst_101 [2] : vector<2x8x8xf32> to vector<2x8xf32>
    %238 = vector.shape_cast %237 : vector<2x8xf32> to vector<2x8x1xf32>
    %239 = tpu.reciprocal %238 {approx = true} : vector<2x8x1xf32> -> vector<2x8x1xf32>
    %240 = vector.broadcast %239 : vector<2x8x1xf32> to vector<2x8x8xf32>
    %241 = arith.mulf %236, %240 : vector<2x8x8xf32>
    %242 = arith.truncf %241 : vector<2x8x8xf32> to vector<2x8x8xbf16>
    %243 = arith.truncf %227 : vector<2x8x16xf32> to vector<2x8x16xbf16>
    "tpu.trace_start"() <{level = 10 : i32, message = "bqk,bkd->bqd"}> : () -> ()
    %cst_102 = arith.constant dense<0.000000e+00> : vector<2x8x16xf32>
    %244 = tpu.matmul %242, %243, %cst_102 {dimension_numbers = #tpu.dot_dimension_numbers<[2], [1], [1], [2], [0, 0, 0, 1, 1, 2], [0], [0]>} : vector<2x8x8xbf16>, vector<2x8x16xbf16>, vector<2x8x16xf32> -> vector<2x8x16xf32>
    "tpu.trace_stop"() : () -> ()
    %245 = vector.shape_cast %244 : vector<2x8x16xf32> to vector<16x16xf32>
    %c1_103 = arith.constant 1 : index
    %c1_104 = arith.constant 1 : index
    %c0_105 = arith.constant 0 : index
    %c0_106 = arith.constant 0 : index
    %246 = vector.load %arg6[%c1_103, %c1_104, %c0_105, %c0_106] : memref<2x2x16x32xbf16, #tpu.memory_space<vmem>>, vector<1x1x16x32xbf16>
    %247 = vector.shape_cast %246 : vector<1x1x16x32xbf16> to vector<16x32xbf16>
    %248 = arith.truncf %245 : vector<16x16xf32> to vector<16x16xbf16>
    %cst_107 = arith.constant dense<0.000000e+00> : vector<16x32xf32>
    %249 = tpu.matmul %248, %247, %cst_107 {dimension_numbers = #tpu.dot_dimension_numbers<[1], [0], [0], [1], [0, 0, 1, 1], [], []>} : vector<16x16xbf16>, vector<16x32xbf16>, vector<16x32xf32> -> vector<16x32xf32>
    %250 = arith.addf %224, %249 : vector<16x32xf32>
    %c1_108 = arith.constant 1 : index
    %c0_109 = arith.constant 0 : index
    %c0_110 = arith.constant 0 : index
    %251 = vector.load %arg7[%c1_108, %c0_109, %c0_110] : memref<2x1x32xf32, #tpu.memory_space<vmem>>, vector<1x1x32xf32>
    %252 = vector.shape_cast %251 : vector<1x1x32xf32> to vector<1x32xf32>
    %253 = vector.broadcast %252 : vector<1x32xf32> to vector<16x32xf32>
    %254 = arith.addf %250, %253 : vector<16x32xf32>
    %255 = arith.addf %254, %188 : vector<16x32xf32>
    %c1_111 = arith.constant 1 : index
    %c0_112 = arith.constant 0 : index
    %c0_113 = arith.constant 0 : index
    %256 = vector.load %arg8[%c1_111, %c0_112, %c0_113] : memref<2x1x32xf32, #tpu.memory_space<vmem>>, vector<1x1x32xf32>
    %257 = vector.shape_cast %256 : vector<1x1x32xf32> to vector<1x32xf32>
    %c1_114 = arith.constant 1 : index
    %c0_115 = arith.constant 0 : index
    %c0_116 = arith.constant 0 : index
    %258 = vector.load %arg9[%c1_114, %c0_115, %c0_116] : memref<2x1x32xf32, #tpu.memory_space<vmem>>, vector<1x1x32xf32>
    %259 = vector.shape_cast %258 : vector<1x1x32xf32> to vector<1x32xf32>
    %cst_117 = arith.constant dense<0.000000e+00> : vector<16xf32>
    %260 = vector.multi_reduction <add>, %255, %cst_117 [1] : vector<16x32xf32> to vector<16xf32>
    %261 = vector.shape_cast %260 : vector<16xf32> to vector<16x1xf32>
    %cst_118 = arith.constant 3.200000e+01 : f32
    %262 = vector.broadcast %cst_118 : f32 to vector<16x1xf32>
    %263 = arith.divf %261, %262 : vector<16x1xf32>
    %264 = vector.broadcast %263 : vector<16x1xf32> to vector<16x32xf32>
    %265 = arith.subf %255, %264 : vector<16x32xf32>
    %266 = vector.broadcast %263 : vector<16x1xf32> to vector<16x32xf32>
    %267 = arith.subf %255, %266 : vector<16x32xf32>
    %268 = arith.mulf %265, %267 : vector<16x32xf32>
    %cst_119 = arith.constant dense<0.000000e+00> : vector<16xf32>
    %269 = vector.multi_reduction <add>, %268, %cst_119 [1] : vector<16x32xf32> to vector<16xf32>
    %270 = vector.shape_cast %269 : vector<16xf32> to vector<16x1xf32>
    %cst_120 = arith.constant 3.200000e+01 : f32
    %271 = vector.broadcast %cst_120 : f32 to vector<16x1xf32>
    %272 = arith.divf %270, %271 : vector<16x1xf32>
    %273 = vector.broadcast %263 : vector<16x1xf32> to vector<16x32xf32>
    %274 = arith.subf %255, %273 : vector<16x32xf32>
    %cst_121 = arith.constant 9.99999996E-13 : f32
    %275 = vector.broadcast %cst_121 : f32 to vector<16x1xf32>
    %276 = arith.addf %272, %275 : vector<16x1xf32>
    %277 = math.rsqrt %276 : vector<16x1xf32>
    %278 = vector.broadcast %277 : vector<16x1xf32> to vector<16x32xf32>
    %279 = arith.mulf %274, %278 : vector<16x32xf32>
    %280 = vector.broadcast %257 : vector<1x32xf32> to vector<16x32xf32>
    %281 = arith.mulf %279, %280 : vector<16x32xf32>
    %282 = vector.broadcast %259 : vector<1x32xf32> to vector<16x32xf32>
    %283 = arith.addf %281, %282 : vector<16x32xf32>
    %c1_122 = arith.constant 1 : index
    %c0_123 = arith.constant 0 : index
    %c0_124 = arith.constant 0 : index
    %284 = vector.load %arg10[%c1_122, %c0_123, %c0_124] : memref<2x32x64xbf16, #tpu.memory_space<vmem>>, vector<1x32x64xbf16>
    %285 = vector.shape_cast %284 : vector<1x32x64xbf16> to vector<32x64xbf16>
    %286 = arith.truncf %283 : vector<16x32xf32> to vector<16x32xbf16>
    %cst_125 = arith.constant dense<0.000000e+00> : vector<16x64xf32>
    %287 = tpu.matmul %286, %285, %cst_125 {dimension_numbers = #tpu.dot_dimension_numbers<[1], [0], [0], [1], [0, 0, 1, 1], [], []>} : vector<16x32xbf16>, vector<32x64xbf16>, vector<16x64xf32> -> vector<16x64xf32>
    %c1_126 = arith.constant 1 : index
    %c0_127 = arith.constant 0 : index
    %c0_128 = arith.constant 0 : index
    %288 = vector.load %arg11[%c1_126, %c0_127, %c0_128] : memref<2x1x64xf32, #tpu.memory_space<vmem>>, vector<1x1x64xf32>
    %289 = vector.shape_cast %288 : vector<1x1x64xf32> to vector<1x64xf32>
    %290 = vector.broadcast %289 : vector<1x64xf32> to vector<16x64xf32>
    %291 = arith.addf %287, %290 : vector<16x64xf32>
    %cst_129 = arith.constant 5.000000e-01 : f32
    %292 = vector.broadcast %cst_129 : f32 to vector<16x64xf32>
    %293 = arith.mulf %292, %291 : vector<16x64xf32>
    %cst_130 = arith.constant 4.471500e-02 : f32
    %294 = vector.broadcast %cst_130 : f32 to vector<16x64xf32>
    %295 = arith.mulf %294, %291 : vector<16x64xf32>
    %296 = arith.mulf %295, %291 : vector<16x64xf32>
    %297 = arith.mulf %296, %291 : vector<16x64xf32>
    %298 = arith.addf %291, %297 : vector<16x64xf32>
    %cst_131 = arith.constant 0.797884583 : f32
    %299 = vector.broadcast %cst_131 : f32 to vector<16x64xf32>
    %300 = arith.mulf %299, %298 : vector<16x64xf32>
    %301 = math.tanh %300 : vector<16x64xf32>
    %cst_132 = arith.constant 1.000000e+00 : f32
    %302 = vector.broadcast %cst_132 : f32 to vector<16x64xf32>
    %303 = arith.addf %302, %301 : vector<16x64xf32>
    %304 = arith.mulf %293, %303 : vector<16x64xf32>
    %c1_133 = arith.constant 1 : index
    %c0_134 = arith.constant 0 : index
    %c0_135 = arith.constant 0 : index
    %305 = vector.load %arg12[%c1_133, %c0_134, %c0_135] : memref<2x64x32xbf16, #tpu.memory_space<vmem>>, vector<1x64x32xbf16>
    %306 = vector.shape_cast %305 : vector<1x64x32xbf16> to vector<64x32xbf16>
    %307 = arith.truncf %304 : vector<16x64xf32> to vector<16x64xbf16>
    %cst_136 = arith.constant dense<0.000000e+00> : vector<16x32xf32>
    %308 = tpu.matmul %307, %306, %cst_136 {dimension_numbers = #tpu.dot_dimension_numbers<[1], [0], [0], [1], [0, 0, 1, 1], [], []>} : vector<16x64xbf16>, vector<64x32xbf16>, vector<16x32xf32> -> vector<16x32xf32>
    %c1_137 = arith.constant 1 : index
    %c0_138 = arith.constant 0 : index
    %c0_139 = arith.constant 0 : index
    %309 = vector.load %arg13[%c1_137, %c0_138, %c0_139] : memref<2x1x32xf32, #tpu.memory_space<vmem>>, vector<1x1x32xf32>
    %310 = vector.shape_cast %309 : vector<1x1x32xf32> to vector<1x32xf32>
    %311 = vector.broadcast %310 : vector<1x32xf32> to vector<16x32xf32>
    %312 = arith.addf %308, %311 : vector<16x32xf32>
    %313 = arith.addf %312, %283 : vector<16x32xf32>
    %c1_140 = arith.constant 1 : index
    %c0_141 = arith.constant 0 : index
    %c0_142 = arith.constant 0 : index
    %314 = vector.load %arg14[%c1_140, %c0_141, %c0_142] : memref<2x1x32xf32, #tpu.memory_space<vmem>>, vector<1x1x32xf32>
    %315 = vector.shape_cast %314 : vector<1x1x32xf32> to vector<1x32xf32>
    %c1_143 = arith.constant 1 : index
    %c0_144 = arith.constant 0 : index
    %c0_145 = arith.constant 0 : index
    %316 = vector.load %arg15[%c1_143, %c0_144, %c0_145] : memref<2x1x32xf32, #tpu.memory_space<vmem>>, vector<1x1x32xf32>
    %317 = vector.shape_cast %316 : vector<1x1x32xf32> to vector<1x32xf32>
    %cst_146 = arith.constant dense<0.000000e+00> : vector<16xf32>
    %318 = vector.multi_reduction <add>, %313, %cst_146 [1] : vector<16x32xf32> to vector<16xf32>
    %319 = vector.shape_cast %318 : vector<16xf32> to vector<16x1xf32>
    %cst_147 = arith.constant 3.200000e+01 : f32
    %320 = vector.broadcast %cst_147 : f32 to vector<16x1xf32>
    %321 = arith.divf %319, %320 : vector<16x1xf32>
    %322 = vector.broadcast %321 : vector<16x1xf32> to vector<16x32xf32>
    %323 = arith.subf %313, %322 : vector<16x32xf32>
    %324 = vector.broadcast %321 : vector<16x1xf32> to vector<16x32xf32>
    %325 = arith.subf %313, %324 : vector<16x32xf32>
    %326 = arith.mulf %323, %325 : vector<16x32xf32>
    %cst_148 = arith.constant dense<0.000000e+00> : vector<16xf32>
    %327 = vector.multi_reduction <add>, %326, %cst_148 [1] : vector<16x32xf32> to vector<16xf32>
    %328 = vector.shape_cast %327 : vector<16xf32> to vector<16x1xf32>
    %cst_149 = arith.constant 3.200000e+01 : f32
    %329 = vector.broadcast %cst_149 : f32 to vector<16x1xf32>
    %330 = arith.divf %328, %329 : vector<16x1xf32>
    %331 = vector.broadcast %321 : vector<16x1xf32> to vector<16x32xf32>
    %332 = arith.subf %313, %331 : vector<16x32xf32>
    %cst_150 = arith.constant 9.99999996E-13 : f32
    %333 = vector.broadcast %cst_150 : f32 to vector<16x1xf32>
    %334 = arith.addf %330, %333 : vector<16x1xf32>
    %335 = math.rsqrt %334 : vector<16x1xf32>
    %336 = vector.broadcast %335 : vector<16x1xf32> to vector<16x32xf32>
    %337 = arith.mulf %332, %336 : vector<16x32xf32>
    %338 = vector.broadcast %315 : vector<1x32xf32> to vector<16x32xf32>
    %339 = arith.mulf %337, %338 : vector<16x32xf32>
    %340 = vector.broadcast %317 : vector<1x32xf32> to vector<16x32xf32>
    %341 = arith.addf %339, %340 : vector<16x32xf32>
    %342 = vector.shape_cast %341 : vector<16x32xf32> to vector<2x8x32xf32>
    %cst_151 = arith.constant dense<0.000000e+00> : vector<2x32xf32>
    %343 = vector.multi_reduction <add>, %342, %cst_151 [1] : vector<2x8x32xf32> to vector<2x32xf32>
    %cst_152 = arith.constant 8.000000e+00 : f32
    %344 = vector.broadcast %cst_152 : f32 to vector<2x32xf32>
    %345 = arith.divf %343, %344 : vector<2x32xf32>
    %cst_153 = arith.constant dense<0xFF800000> : vector<2x32xf32>
    %346 = vector.multi_reduction <maximumf>, %342, %cst_153 [1] : vector<2x8x32xf32> to vector<2x32xf32>
    %c0_154 = arith.constant 0 : index
    %c0_155 = arith.constant 0 : index
    %347 = vector.load %arg16[%c0_154, %c0_155] : memref<2x32xf32, #tpu.memory_space<vmem>>, vector<2x32xf32>
    %348 = vector.extract_strided_slice %347 {offsets = [0, 0], sizes = [1, 32], strides = [1, 1]} : vector<2x32xf32> to vector<1x32xf32>
    %349 = vector.broadcast %348 : vector<1x32xf32> to vector<2x32xf32>
    %350 = arith.mulf %345, %349 : vector<2x32xf32>
    %351 = vector.extract_strided_slice %347 {offsets = [1, 0], sizes = [1, 32], strides = [1, 1]} : vector<2x32xf32> to vector<1x32xf32>
    %352 = vector.broadcast %351 : vector<1x32xf32> to vector<2x32xf32>
    %353 = arith.mulf %346, %352 : vector<2x32xf32>
    %354 = arith.addf %350, %353 : vector<2x32xf32>
    %cst_156 = arith.constant dense<0.000000e+00> : vector<2xf32>
    %355 = vector.multi_reduction <add>, %354, %cst_156 [1] : vector<2x32xf32> to vector<2xf32>
    %356 = vector.shape_cast %355 : vector<2xf32> to vector<2x1xf32>
    %c0_157 = arith.constant 0 : index
    %c0_158 = arith.constant 0 : index
    %357 = vector.load %arg17[%c0_157, %c0_158] : memref<1x1xf32, #tpu.memory_space<vmem>>, vector<1x1xf32>
    %358 = vector.broadcast %357 : vector<1x1xf32> to vector<2x1xf32>
    %359 = arith.addf %356, %358 : vector<2x1xf32>
    %c0_159 = arith.constant 0 : index
    %c0_160 = arith.constant 0 : index
    %360 = vector.load %arg18[%c0_159, %c0_160] : memref<2x1xf32, #tpu.memory_space<vmem>>, vector<2x1xf32>
    tpu.vector_store %arg18[%c0_159, %c0_160], %359 {strides = array<i32>} : memref<2x1xf32, #tpu.memory_space<vmem>>, vector<2x1xf32>,
    return
  }
}

</mosaic_0001>

<bundles_post_ra>
// kernel: bert_pooled_classifier.1
= control target key start
LH: loop header
LB: loop body
LE: loop exit
PB: predicated region body
PF: predicated region fallthrough
CT: control target
= control target key end

     0   :  { %vm66_vm0 = vcmask 261120   ;;  %v2425_v15 = vmov 0.0   ;;  %vm2426_vm1 = vmmov 0   ;;  %vm219_vm2 = vcmask 130048   ;;  %s2431_s19 = smov 112   ;;  %s2929_s0 = inlined_call_operand.vmem [shape: f32[2,8,32], index: 0, kind: input, shape index: {}]   ;;  %s2930_s4 = inlined_call_operand.vmem [shape: bf16[2,32,96], index: 4, kind: input, shape index: {}]   ;;  %s2931_s2 = inlined_call_operand.vmem [shape: f32[1,32], index: 2, kind: input, shape index: {}]   ;;  %s2932_s3 = inlined_call_operand.vmem [shape: f32[1,32], index: 3, kind: input, shape index: {}]   ;;  %s2933_s5 = inlined_call_operand.vmem [shape: f32[2,1,96], index: 5, kind: input, shape index: {}]   ;;  %s2934_s1 = inlined_call_operand.vmem [shape: f32[2,8], index: 1, kind: input, shape index: {}]   ;;  %s2935_s6 = inlined_call_operand.vmem [shape: bf16[2,2,16,32], index: 6, kind: input, shape index: {}]   ;;  %s2936_s7 = inlined_call_operand.vmem [shape: f32[2,1,32], index: 7, kind: input, shape index: {}]   ;;  %s2937_s10 = inlined_call_operand.vmem [shape: bf16[2,32,64], index: 10, kind: input, shape index: {}]   ;;  %s2938_s8 = inlined_call_operand.vmem [shape: f32[2,1,32], index: 8, kind: input, shape index: {}]   ;;  %s2939_s9 = inlined_call_operand.vmem [shape: f32[2,1,32], index: 9, kind: input, shape index: {}]   ;;  %s2940_s12 = inlined_call_operand.vmem [shape: bf16[2,64,32], index: 12, kind: input, shape index: {}]   ;;  %s2941_s11 = inlined_call_operand.vmem [shape: f32[2,1,64], index: 11, kind: input, shape index: {}]   ;;  %s2942_s13 = inlined_call_operand.vmem [shape: f32[2,1,32], index: 13, kind: input, shape index: {}]   ;;  %s2943_s14 = inlined_call_operand.vmem [shape: f32[2,1,32], index: 14, kind: input, shape index: {}]   ;;  %s2944_s15 = inlined_call_operand.vmem [shape: f32[2,1,32], index: 15, kind: input, shape index: {}]   ;;  %s2945_s17 = inlined_call_operand.<no memory space> [shape: f32[1,1], index: 17, kind: input, shape index: {}]   ;;  %s2946_s16 = inlined_call_operand.vmem [shape: f32[2,32], index: 16, kind: input, shape index: {}]   ;;  %s2947_s18 = inlined_call_operand.vmem [shape: f32[2,1], index: 18, kind: output, shape index: {}]  }
   0x1   :  { %2950 = sst [smem:[#allocation3_spill]] %s2929_s0  ;;  %2161 = vmatprep.subr.bf16.mxu1 %v2425_v15  ;;  %2175 = vmatprep.subr.bf16.mxu0 %v2425_v15  ;;  %v2005_v29 = vld [vmem:[%s2932_s3] ss:$0 sm:$0xff]  ;;  %s2427_s3 = smov 96   ;;  %v2428_v47 = vmov 1966171168   ;;  %v117_v49 = vlaneseq }
   0x2   :  { %2951 = sst [smem:[#allocation4_spill]] %s2930_s4  ;;  %s2953_s29 = sld [smem:[#allocation3_spill]]  ;;  %2165 = vmatprep.mubr.msk.bf16.mxu1 %vm2426_vm1, %v2425_v15  ;;  %2177 = vmatprep.mubr.msk.bf16.mxu0 %vm2426_vm1, %v2425_v15  ;;  %v2006_v34 = vld [vmem:[%s2933_s5] ss:$0 sm:$0xff]  ;;  %v115_v48 = vunpack.c.l.s4 %v2428_v47  ;;  %vm315_vm3 = vcmask 64512   ;;  %vm345_vm4 = vcmask 1043456  }
   0x3   :  { %2952 = sst [smem:[#allocation5_spill]] %s2931_s2  ;;  %s2954_s20 = sld [smem:[#allocation4_spill]]  ;;  %v110_v50 = vld [vmem:[%s2934_s1] sm:$0x3]  ;;  %v2593_v53 = vshrl.u32 %v117_v49, 7  ;;  %vm945_vm5 = vcmask 523264  }
   0x4   :  { %s2955_s24 = sld [smem:[#allocation5_spill]]  ;;  %v111_v51 = vsub.f32 1.0, %v110_v50  ;;  %v116_v52 = vunpack.c.0.s8 %v115_v48  ;;  %s2429_s1 = smov 64   ;;  %vm1983_vm6 = vcmask 1041409   ;;  %vm1986_vm7 = vcmask 254976  }
   0x5   :  { %v2597_v59 = vsub.s32 0, %v2593_v53  ;;  %s2430_s0 = smov 80   ;;  %s2432_s4 = smov 48   ;;  %vm1998_vm8 = vcmask 1024  }
   0x6   :  { %v112_v54 = vmul.f32 -1e+09, %v111_v51  ;;  %v119_v55 = vsub.s32 %v116_v52, %v2593_v53 }
   0x8   :  { %v62_v0 = vld [vmem:[%s2953_s29] sm:$0xff]  ;;  %v63_v1 = vld [vmem:[%s2953_s29 + $0x8] sm:$0xff]  ;;  %v120_v56 = vrot.slane %v112_v54, %v119_v55 }
   0x9   :  { %v67_v2 = vsel %vm66_vm0, %v62_v0, 0.0  ;;  %v70_v3 = vsel %vm66_vm0, %v63_v1, 0.0  ;;  %v2345_v14 = vld [vmem:[%s2954_s20] sm:$0xff]   ;;  %v2346_v16 = vld [vmem:[%s2954_s20 + $0x8] sm:$0xff]  }
   0xa   :  { %68 = vadd.xlane.f32.xlu0 %v67_v2  ;;  %2162 = vmatpush3.bf16.msra.mxu1 %v2345_v14  ;;  %v2004_v25 = vld [vmem:[%s2955_s24] ss:$0 sm:$0xff]  ;;  %v121_v57 = vcombine.high %v120_v56, %v120_v56  ;;  %v128_v58 = vrot.slane %v120_v56, %v119_v55 }
   0xb   :  { %2163 = vmatprep.subr.bf16.mxu1 %v2425_v15 }
   0xc   :  { %v135_v60 = vrot.slane %v121_v57, %v119_v55  ;;  %v2600_v61 = vrot.slane %v128_v58, %v2597_v59 }
   0xe   :  { %71 = vadd.xlane.f32.xlu0 %v70_v3  ;;  %2164 = vmatpush3.bf16.msra.mxu1 %v2346_v16  ;;  %v2603_v62 = vrot.slane %v135_v60, %v2597_v59 }
   0xf   :  { %2169 = vmatprep.subr.bf16.mxu1 %v2425_v15 }
  0x97   :  { %v69_v4 = vpop.xlane.xlu0 %68 }
  0x98   :  { %v74_v5 = vmul.f32 0.03125, %v69_v4 }
  0x9a   :  { %v76_v6 = vsub.f32 %v62_v0, %v74_v5 }
  0x9b   :  { %v72_v7 = vpop.xlane.xlu0 %71 }
  0x9c   :  { %v75_v8 = vmul.f32 0.03125, %v72_v7  ;;  %v78_v9 = vmul.f32 %v76_v6, %v76_v6 }
  0x9e   :  { %v77_v10 = vsub.f32 %v63_v1, %v75_v8  ;;  %v80_v11 = vsel %vm66_vm0, %v78_v9, 0.0 }
  0x9f   :  { %81 = vadd.xlane.f32.xlu1 %v80_v11 }
  0xa0   :  { %v79_v12 = vmul.f32 %v77_v10, %v77_v10 }
  0xa2   :  { %v83_v13 = vsel %vm66_vm0, %v79_v12, 0.0 }
  0xa3   :  { %84 = vadd.xlane.f32.xlu1 %v83_v13 }
 0x12c   :  { %v82_v17 = vpop.xlane.xlu1 %81 }
 0x12d   :  { %v86_v18 = vmul.f32 0.03125, %v82_v17 }
 0x12f   :  { %v88_v19 = vadd.f32 1e-12, %v86_v18 }
 0x130   :  { %v85_v20 = vpop.xlane.xlu1 %84 }
 0x131   :  { %2365 = vrsqrt.f32 %v88_v19  ;;  %v87_v21 = vmul.f32 0.03125, %v85_v20 }
 0x133   :  { %v89_v22 = vadd.f32 1e-12, %v87_v21 }
 0x135   :  { %2367 = vrsqrt.f32 %v89_v22 }
 0x13b   :  { %v2366_v23 = vpop.eup %2365 }
 0x13c   :  { %v92_v24 = vmul.f32 %v2366_v23, %v76_v6 }
 0x13e   :  { %v100_v28 = vmul.f32 %v2004_v25, %v92_v24 }
 0x13f   :  { %v2368_v26 = vpop.eup %2367 }
 0x140   :  { %v93_v27 = vmul.f32 %v2368_v26, %v77_v10  ;;  %v2558_v31 = vadd.f32 %v2005_v29, %v100_v28 }
 0x142   :  { %v101_v30 = vmul.f32 %v2004_v25, %v93_v27 }
 0x144   :  { %v2560_v32 = vadd.f32 %v2005_v29, %v101_v30 }
 0x146   :  { %v150_v33 = vpack.c.bf16 %v2560_v32, %v2558_v31 }
 0x148   :  { %2166 = vmatmul.mubr.msk.bf16.vlgmr.msra.gmra.mrb[0].mxu1 %vm66_vm0, %v150_v33 }
 0x149   :  { %2171 = vmatprep.mubr.msk.bf16.mxu1 %vm2426_vm1, %v2425_v15 }
 0x21b   :  { %v207_v35 = vpop.f32.mrb[0].mxu1 }
 0x21c   :  { %v208_v36 = vadd.f32 %v2006_v34, %v207_v35  ;;  %v2167_v37 = vpop.f32.mrb[1].mxu1 }
 0x21d   :  { %v210_v38 = vpop.f32.mrb[2].mxu1 }
 0x21e   :  { %v2570_v39 = vpack.c.bf16 %v208_v36, %v208_v36  ;;  %v211_v40 = vadd.f32 %v2006_v34, %v210_v38  ;;  %v2168_v41 = vpop.f32.mrb[3].mxu1 }
 0x220   :  { %v2572_v42 = vpack.c.bf16 %v211_v40, %v211_v40  ;;  %217 = vrot.lane.b32.xlu0 %v2570_v39, %s2427_s3 }
 0x222   :  { %267 = vrot.lane.b32.xlu1 %v2572_v42, %s2427_s3 }
 0x292   :  { %v218_v43 = vpop.permute.xlu0 %217 }
 0x293   :  { %v224_v44 = vsel %vm219_vm2, %v218_v43, 0 }
 0x294   :  { %2170 = vmatpush3.bf16.xpose.msra.mxu1 %v224_v44  ;;  %v268_v45 = vpop.permute.xlu1 %267 }
 0x295   :  { %v273_v46 = vsel %vm219_vm2, %v268_v45, 0  ;;  %2181 = vmatprep.subr.bf16.mxu1 %v2425_v15 }
 0x296   :  { %2176 = vmatpush3.bf16.xpose.msra.mxu0 %v273_v46 }
 0x297   :  { %2187 = vmatprep.subr.bf16.mxu0 %v2425_v15 }
 0x29b   :  { %2172 = vmatmul.mubr.msk.bf16.vlgmr.msra.gmra.mrb[4].mxu1 %vm219_vm2, %v2570_v39 }
 0x29c   :  { %2183 = vmatprep.mubr.msk.bf16.mxu1 %vm2426_vm1, %v2425_v15 }
 0x29d   :  { %2178 = vmatmul.mubr.msk.bf16.vlgmr.msra.gmra.mrb[0].mxu0 %vm219_vm2, %v2572_v42 }
 0x29e   :  { %2189 = vmatprep.mubr.msk.bf16.mxu0 %vm2426_vm1, %v2425_v15 }
 0x36e   :  { %v260_v63 = vpop.f32.mrb[4].mxu1 }
 0x36f   :  { %v261_v0 = vadd.f32 %v260_v63, %v2600_v61  ;;  %v2173_v1 = vpop.f32.mrb[5].mxu1 }
 0x370   :  { %v263_v2 = vpop.f32.mrb[6].mxu1  ;;  %v309_v3 = vpop.f32.mrb[0].mxu0 }
 0x371   :  { %v310_v4 = vadd.f32 %v309_v3, %v2603_v62  ;;  %v2174_v5 = vpop.f32.mrb[7].mxu1  ;;  %v2179_v6 = vpop.f32.mrb[1].mxu0  ;;  %v316_v7 = vsel %vm315_vm3, %v261_v0, -inf }
 0x372   :  { %v312_v8 = vpop.f32.mrb[2].mxu0  ;;  %317 = vmax.xlane.f32.xlu1 %v316_v7 }
 0x373   :  { %v2180_v9 = vpop.f32.mrb[3].mxu0  ;;  %v319_v10 = vsel %vm315_vm3, %v310_v4, -inf }
 0x374   :  { %320 = vmax.xlane.f32.xlu0 %v319_v10 }
 0x383   :  { %389 = vrot.lane.b32.xlu1 %v2572_v42, %s2429_s1 }
 0x387   :  { %442 = vrot.lane.b32.xlu1 %v2570_v39, %s2430_s0 }
 0x3ff   :  { %v318_v11 = vpop.xlane.xlu1 %317 }
 0x400   :  { %v322_v12 = vsub.f32 %v261_v0, %v318_v11 }
 0x401   :  { %v321_v13 = vpop.xlane.xlu0 %320 }
 0x402   :  { %v324_v14 = vmul.f32 1.442695, %v322_v12  ;;  %v323_v16 = vsub.f32 %v310_v4, %v321_v13 }
 0x403   :  { %v390_v17 = vpop.permute.xlu1 %389 }
 0x404   :  { %2369 = vpow2.f32 %v324_v14  ;;  %v326_v18 = vmul.f32 1.442695, %v323_v16  ;;  %v395_v19 = vsel %vm345_vm4, %v390_v17, 0 }
 0x405   :  { %2188 = vmatpush3.bf16.msra.mxu0 %v395_v19 }
 0x406   :  { %2371 = vpow2.f32 %v326_v18  ;;  %2199 = vmatprep.subr.bf16.mxu0 %v2425_v15 }
 0x407   :  { %v443_v24 = vpop.permute.xlu1 %442 }
 0x408   :  { %v448_v37 = vsel %vm219_vm2, %v443_v24, 0 }
 0x40e   :  { %v2370_v20 = vpop.eup %2369 }
 0x40f   :  { %v328_v21 = vsel %vm315_vm3, %v2370_v20, 0.0 }
 0x410   :  { %v2372_v22 = vpop.eup %2371  ;;  %329 = vadd.xlane.f32.xlu0 %v328_v21 }
 0x411   :  { %v331_v23 = vsel %vm315_vm3, %v2372_v22, 0.0 }
 0x412   :  { %332 = vadd.xlane.f32.xlu1 %v331_v23 }
 0x423   :  { %492 = vrot.lane.b32.xlu1 %v2572_v42, %s2430_s0 }
 0x426   :  { %340 = vrot.lane.b32.xlu0 %v2570_v39, %s2429_s1 }
 0x427   :  { %490 = vrot.lane.b32.xlu1 %v2572_v42, %s2431_s19 }
 0x42a   :  { %440 = vrot.lane.b32.xlu0 %v2570_v39, %s2431_s19 }
 0x49d   :  { %v330_v25 = vpop.xlane.xlu0 %329 }
 0x49e   :  { %2373 = vrcp.f32 %v330_v25 }
 0x49f   :  { %v333_v26 = vpop.xlane.xlu1 %332 }
 0x4a0   :  { %2375 = vrcp.f32 %v333_v26 }
 0x4a1   :  { %v341_v27 = vpop.permute.xlu0 %340 }
 0x4a2   :  { %v347_v28 = vsel %vm345_vm4, %v341_v27, 0  ;;  %v2348_v27 = vld [vmem:[%s2935_s6 + $0x8] sm:$0xff]  }
 0x4a3   :  { %2182 = vmatpush3.bf16.msra.mxu1 %v347_v28  ;;  %v493_v36 = vpop.permute.xlu1 %492 }
 0x4a4   :  { %2193 = vmatprep.subr.bf16.mxu1 %v2425_v15  ;;  %v498_v40 = vsel %vm219_vm2, %v493_v36, 0 }
 0x4a5   :  { %v441_v41 = vpop.permute.xlu0 %440 }
 0x4a7   :  { %v491_v43 = vpop.permute.xlu1 %490 }
 0x4a8   :  { %v2374_v29 = vpop.eup %2373 }
 0x4a9   :  { %v336_v30 = vmul.f32 %v2374_v29, %v2370_v20 }
 0x4aa   :  { %v2376_v33 = vpop.eup %2375 }
 0x4ab   :  { %v337_v34 = vmul.f32 %v2376_v33, %v2372_v22  ;;  %v338_v35 = vpack.c.bf16 %v336_v30, %v336_v30 }
 0x4ad   :  { %2184 = vmatmul.mubr.msk.bf16.vlgmr.msra.gmra.mrb[8].mxu1 %vm315_vm3, %v338_v35  ;;  %v339_v38 = vpack.c.bf16 %v337_v34, %v337_v34 }
 0x4ae   :  { %2194 = vmatpush3.bf16.xpose.msra.mxu1 %v448_v37  ;;  %2195 = vmatprep.mubr.msk.bf16.mxu1 %vm2426_vm1, %v2425_v15 }
 0x4af   :  { %2190 = vmatmul.mubr.msk.bf16.vlgmr.msra.gmra.mrb[4].mxu0 %vm315_vm3, %v339_v38  ;;  %2205 = vmatprep.subr.bf16.mxu1 %v2425_v15 }
 0x4b0   :  { %2200 = vmatpush3.bf16.xpose.msra.mxu0 %v498_v40  ;;  %2201 = vmatprep.mubr.msk.bf16.mxu0 %vm2426_vm1, %v2425_v15 }
 0x4b1   :  { %2211 = vmatprep.subr.bf16.mxu0 %v2425_v15 }
 0x4b5   :  { %2196 = vmatmul.mubr.msk.bf16.vlgmr.msra.gmra.mrb[12].mxu1 %vm219_vm2, %v441_v41 }
 0x4b6   :  { %2207 = vmatprep.mubr.msk.bf16.mxu1 %vm2426_vm1, %v2425_v15 }
 0x4b7   :  { %2202 = vmatmul.mubr.msk.bf16.vlgmr.msra.gmra.mrb[8].mxu0 %vm219_vm2, %v491_v43 }
 0x4b8   :  { %2213 = vmatprep.mubr.msk.bf16.mxu0 %vm2426_vm1, %v2425_v15 }
 0x580   :  { %v2643_v44 = vpop.f32.mrb[8].mxu1 }
 0x581   :  { %v2185_v45 = vpop.f32.mrb[9].mxu1 }
 0x582   :  { %v386_v46 = vpop.f32.mrb[10].mxu1  ;;  %v2645_v47 = vpop.f32.mrb[4].mxu0 }
 0x583   :  { %v439_v48 = vpack.c.bf16 %v2645_v47, %v2643_v44  ;;  %v2186_v49 = vpop.f32.mrb[11].mxu1  ;;  %v2191_v50 = vpop.f32.mrb[5].mxu0  ;;  %v2024_v46 = vld [vmem:[%s2936_s7] ss:$0 sm:$0xff] }
 0x584   :  { %v434_v51 = vpop.f32.mrb[6].mxu0 }
 0x585   :  { %v2192_v52 = vpop.f32.mrb[7].mxu0 }
 0x588   :  { %v484_v54 = vpop.f32.mrb[12].mxu1 }
 0x589   :  { %v485_v55 = vadd.f32 %v484_v54, %v2600_v61  ;;  %v2197_v56 = vpop.f32.mrb[13].mxu1 }
 0x58a   :  { %v487_v57 = vpop.f32.mrb[14].mxu1  ;;  %v534_v58 = vpop.f32.mrb[8].mxu0 }
 0x58b   :  { %v535_v60 = vadd.f32 %v534_v58, %v2603_v62  ;;  %v2198_v63 = vpop.f32.mrb[15].mxu1  ;;  %v2203_v0 = vpop.f32.mrb[9].mxu0  ;;  %v540_v1 = vsel %vm315_vm3, %v485_v55, -inf }
 0x58c   :  { %v537_v2 = vpop.f32.mrb[10].mxu0  ;;  %541 = vmax.xlane.f32.xlu0 %v540_v1 }
 0x58d   :  { %v2204_v3 = vpop.f32.mrb[11].mxu0  ;;  %v543_v4 = vsel %vm315_vm3, %v535_v60, -inf }
 0x58e   :  { %544 = vmax.xlane.f32.xlu1 %v543_v4 }
 0x59f   :  { %612 = vrot.lane.b32.xlu1 %v2572_v42, %s2432_s4 }
 0x619   :  { %v542_v5 = vpop.xlane.xlu0 %541 }
 0x61a   :  { %v546_v6 = vsub.f32 %v485_v55, %v542_v5 }
 0x61b   :  { %v545_v7 = vpop.xlane.xlu1 %544 }
 0x61c   :  { %v548_v8 = vmul.f32 1.442695, %v546_v6  ;;  %v547_v9 = vsub.f32 %v535_v60, %v545_v7  ;;  %v2350_v7 = vld [vmem:[%s2937_s10 + $0x8] sm:$0xff]  }
 0x61e   :  { %2377 = vpow2.f32 %v548_v8  ;;  %v550_v10 = vmul.f32 1.442695, %v547_v9 }
 0x61f   :  { %v613_v11 = vpop.permute.xlu1 %612 }
 0x620   :  { %2379 = vpow2.f32 %v550_v10  ;;  %v618_v12 = vsel %vm345_vm4, %v613_v11, 0 }
 0x621   :  { %2212 = vmatpush3.bf16.msra.mxu0 %v618_v12 }
 0x622   :  { %2223 = vmatprep.subr.bf16.mxu0 %v2425_v15 }
 0x628   :  { %v2378_v13 = vpop.eup %2377 }
 0x629   :  { %v552_v14 = vsel %vm315_vm3, %v2378_v13, 0.0 }
 0x62a   :  { %v2380_v16 = vpop.eup %2379  ;;  %553 = vadd.xlane.f32.xlu0 %v552_v14 }
 0x62b   :  { %v555_v42 = vsel %vm315_vm3, %v2380_v16, 0.0 }
 0x62e   :  { %556 = vadd.xlane.f32.xlu0 %v555_v42 }
 0x644   :  { %564 = vrot.lane.b32.xlu0 %v2570_v39, %s2432_s4  ;;  %v2347_v39 = vld [vmem:[%s2935_s6] sm:$0xff]  }
 0x6b7   :  { %v554_v17 = vpop.xlane.xlu0 %553 }
 0x6b8   :  { %2381 = vrcp.f32 %v554_v17 }
 0x6bb   :  { %v557_v18 = vpop.xlane.xlu0 %556 }
 0x6bc   :  { %2383 = vrcp.f32 %v557_v18 }
 0x6bf   :  { %v565_v19 = vpop.permute.xlu0 %564 }
 0x6c0   :  { %v570_v20 = vsel %vm345_vm4, %v565_v19, 0 }
 0x6c1   :  { %2206 = vmatpush3.bf16.msra.mxu1 %v570_v20  ;;  %v2026_v20 = vld [vmem:[%s2939_s9] ss:$0 sm:$0xff] }
 0x6c2   :  { %v2382_v21 = vpop.eup %2381  ;;  %2217 = vmatprep.subr.bf16.mxu1 %v2425_v15 }
 0x6c3   :  { %v560_v22 = vmul.f32 %v2382_v21, %v2378_v13 }
 0x6c5   :  { %v562_v23 = vpack.c.bf16 %v560_v22, %v560_v22 }
 0x6c6   :  { %v2384_v24 = vpop.eup %2383 }
 0x6c7   :  { %v561_v25 = vmul.f32 %v2384_v24, %v2380_v16  ;;  %2208 = vmatmul.mubr.msk.bf16.vlgmr.msra.gmra.mrb[16].mxu1 %vm315_vm3, %v562_v23  ;;  %v2025_v16 = vld [vmem:[%s2938_s8] ss:$0 sm:$0xff] }
 0x6c8   :  { %2219 = vmatprep.mubr.msk.bf16.mxu1 %vm2426_vm1, %v2425_v15  ;;  %2218 = vmatpush3.bf16.msra.mxu1 %v2348_v27  ;;  %v2354_v27 = vld [vmem:[%s2940_s12 + $0x18] sm:$0xff]  }
 0x6c9   :  { %v563_v26 = vpack.c.bf16 %v561_v25, %v561_v25  ;;  %2229 = vmatprep.subr.bf16.mxu1 %v2425_v15  ;;  %v2351_v25 = vld [vmem:[%s2940_s12] sm:$0xff]  }
 0x6cb   :  { %2214 = vmatmul.mubr.msk.bf16.vlgmr.msra.gmra.mrb[12].mxu0 %vm315_vm3, %v563_v26  ;;  %v2353_v26 = vld [vmem:[%s2940_s12 + $0x10] sm:$0xff]  }
 0x6cc   :  { %2224 = vmatpush3.bf16.msra.mxu0 %v2347_v39  ;;  %2225 = vmatprep.mubr.msk.bf16.mxu0 %vm2426_vm1, %v2425_v15  ;;  %v2352_v39 = vld [vmem:[%s2940_s12 + $0x8] sm:$0xff]  }
 0x6cd   :  { %2237 = vmatprep.subr.bf16.mxu0 %v2425_v15 }
 0x6d3   :  { %2226 = vmatmul.mubr.msk.bf16.vlgmr.msra.gmra.mrb[16].mxu0 %vm219_vm2, %v439_v48 }
 0x6d4   :  { %2245 = vmatprep.mubr.msk.bf16.mxu0 %vm2426_vm1, %v2425_v15  ;;  %2238 = vmatpush3.bf16.msra.mxu0 %v2351_v25 }
 0x6d5   :  { %2239 = vmatprep.subr.bf16.mxu0 %v2425_v15 }
 0x6d8   :  { %2240 = vmatpush3.bf16.msra.mxu0 %v2352_v39  ;;  %v2037_v39 = vld [vmem:[%s2943_s14] ss:$0 sm:$0xff] }
 0x6d9   :  { %2241 = vmatprep.subr.bf16.mxu0 %v2425_v15 }
 0x6dc   :  { %2242 = vmatpush3.bf16.msra.mxu0 %v2353_v26 }
 0x6dd   :  { %2243 = vmatprep.subr.bf16.mxu0 %v2425_v15 }
 0x6e0   :  { %2244 = vmatpush3.bf16.msra.mxu0 %v2354_v27 }
 0x6e1   :  { %2263 = vmatprep.subr.bf16.mxu0 %v2425_v15 }
 0x79a   :  { %v606_v28 = vpop.f32.mrb[16].mxu1 }
 0x79b   :  { %v2209_v29 = vpop.f32.mrb[17].mxu1 }
 0x79c   :  { %v609_v30 = vpop.f32.mrb[18].mxu1 }
 0x79d   :  { %v2210_v33 = vpop.f32.mrb[19].mxu1 }
 0x79e   :  { %v654_v34 = vpop.f32.mrb[12].mxu0 }
 0x79f   :  { %v663_v35 = vpack.c.bf16 %v654_v34, %v606_v28  ;;  %v2215_v36 = vpop.f32.mrb[13].mxu0  ;;  %v2027_v28 = vld [vmem:[%s2941_s11] ss:$0 sm:$0xff] }
 0x7a0   :  { %v657_v37 = vpop.f32.mrb[14].mxu0 }
 0x7a1   :  { %v2216_v38 = vpop.f32.mrb[15].mxu0  ;;  %2220 = vmatmul.mubr.msk.bf16.vlgmr.msra.gmra.mrb[20].mxu1 %vm219_vm2, %v663_v35 }
 0x7a2   :  { %2233 = vmatprep.mubr.msk.bf16.mxu1 %vm2426_vm1, %v2425_v15 }
 0x7a6   :  { %v757_v40 = vpop.f32.mrb[16].mxu0 }
 0x7a7   :  { %v2227_v41 = vpop.f32.mrb[17].mxu0 }
 0x7a8   :  { %v760_v43 = vpop.f32.mrb[18].mxu0 }
 0x7a9   :  { %v2228_v44 = vpop.f32.mrb[19].mxu0 }
 0x874   :  { %v707_v45 = vpop.f32.mrb[20].mxu1 }
 0x875   :  { %v758_v47 = vadd.f32 %v757_v40, %v707_v45  ;;  %v2221_v48 = vpop.f32.mrb[21].mxu1 }
 0x876   :  { %v710_v49 = vpop.f32.mrb[22].mxu1 }
 0x877   :  { %v771_v50 = vadd.f32 %v2024_v46, %v758_v47  ;;  %v761_v51 = vadd.f32 %v760_v43, %v710_v49  ;;  %v2222_v52 = vpop.f32.mrb[23].mxu1 }
 0x879   :  { %v772_v54 = vadd.f32 %v2024_v46, %v761_v51  ;;  %v773_v55 = vadd.f32 %v771_v50, %v2558_v31 }
 0x87b   :  { %v777_v56 = vsel %vm66_vm0, %v773_v55, 0.0  ;;  %v774_v57 = vadd.f32 %v772_v54, %v2560_v32  ;;  %v2349_v32 = vld [vmem:[%s2937_s10] sm:$0xff]  }
 0x87c   :  { %778 = vadd.xlane.f32.xlu1 %v777_v56  ;;  %2230 = vmatpush3.bf16.msra.mxu1 %v2349_v32 }
 0x87d   :  { %v780_v58 = vsel %vm66_vm0, %v774_v57, 0.0  ;;  %2231 = vmatprep.subr.bf16.mxu1 %v2425_v15 }
 0x87e   :  { %781 = vadd.xlane.f32.xlu0 %v780_v58 }
 0x880   :  { %2232 = vmatpush3.bf16.msra.mxu1 %v2350_v7 }
 0x881   :  { %2249 = vmatprep.subr.bf16.mxu1 %v2425_v15 }
 0x909   :  { %v779_v60 = vpop.xlane.xlu1 %778 }
 0x90a   :  { %v783_v63 = vmul.f32 0.03125, %v779_v60  ;;  %v2031_v60 = vld [vmem:[%s2942_s13] ss:$0 sm:$0xff] }
 0x90b   :  { %v782_v0 = vpop.xlane.xlu0 %781 }
 0x90c   :  { %v785_v1 = vsub.f32 %v773_v55, %v783_v63  ;;  %v784_v2 = vmul.f32 0.03125, %v782_v0 }
 0x90e   :  { %v786_v3 = vsub.f32 %v774_v57, %v784_v2  ;;  %v787_v4 = vmul.f32 %v785_v1, %v785_v1 }
 0x910   :  { %v789_v5 = vsel %vm66_vm0, %v787_v4, 0.0  ;;  %v788_v6 = vmul.f32 %v786_v3, %v786_v3 }
 0x911   :  { %790 = vadd.xlane.f32.xlu0 %v789_v5 }
 0x912   :  { %v792_v31 = vsel %vm66_vm0, %v788_v6, 0.0 }
 0x913   :  { %793 = vadd.xlane.f32.xlu1 %v792_v31 }
 0x99e   :  { %v791_v8 = vpop.xlane.xlu0 %790 }
 0x99f   :  { %v795_v9 = vmul.f32 0.03125, %v791_v8 }
 0x9a0   :  { %v794_v10 = vpop.xlane.xlu1 %793 }
 0x9a1   :  { %v797_v11 = vadd.f32 1e-12, %v795_v9  ;;  %v796_v12 = vmul.f32 0.03125, %v794_v10 }
 0x9a3   :  { %2385 = vrsqrt.f32 %v797_v11  ;;  %v798_v13 = vadd.f32 1e-12, %v796_v12 }
 0x9a5   :  { %2387 = vrsqrt.f32 %v798_v13 }
 0x9ad   :  { %v2386_v14 = vpop.eup %2385 }
 0x9ae   :  { %v801_v42 = vmul.f32 %v2386_v14, %v785_v1 }
 0x9af   :  { %v2388_v17 = vpop.eup %2387 }
 0x9b0   :  { %v809_v18 = vmul.f32 %v2025_v16, %v801_v42  ;;  %v802_v19 = vmul.f32 %v2388_v17, %v786_v3  ;;  %v2355_v17 = vld [vmem:[%s2954_s20 + $0x10] sm:$0xff]  }
 0x9b2   :  { %v810_v21 = vmul.f32 %v2025_v16, %v802_v19  ;;  %v817_v22 = vadd.f32 %v2026_v20, %v809_v18  ;;  %v2356_v18 = vld [vmem:[%s2954_s20 + $0x18] sm:$0xff]  }
 0x9b4   :  { %v818_v23 = vadd.f32 %v2026_v20, %v810_v21 }
 0x9b6   :  { %v823_v24 = vpack.c.bf16 %v818_v23, %v817_v22 }
 0x9b8   :  { %2234 = vmatmul.mubr.msk.bf16.vlgmr.msra.gmra.mrb[24].mxu1 %vm66_vm0, %v823_v24 }
 0x9b9   :  { %2253 = vmatprep.mubr.msk.bf16.mxu1 %vm2426_vm1, %v2425_v15  ;;  %2250 = vmatpush3.bf16.msra.mxu1 %v2355_v17 }
 0x9ba   :  { %2251 = vmatprep.subr.bf16.mxu1 %v2425_v15 }
 0x9bd   :  { %2252 = vmatpush3.bf16.msra.mxu1 %v2356_v18 }
 0x9be   :  { %2257 = vmatprep.subr.bf16.mxu1 %v2425_v15 }
 0xa8b   :  { %v880_v29 = vpop.f32.mrb[24].mxu1 }
 0xa8c   :  { %v881_v30 = vadd.f32 %v2027_v28, %v880_v29  ;;  %v2235_v33 = vpop.f32.mrb[25].mxu1 }
 0xa8d   :  { %v883_v34 = vpop.f32.mrb[26].mxu1 }
 0xa8e   :  { %v889_v35 = vmul.f32 0.044715, %v881_v30  ;;  %v884_v36 = vadd.f32 %v2027_v28, %v883_v34  ;;  %v2236_v37 = vpop.f32.mrb[27].mxu1  ;;  %v887_v52 = vmul.f32 0.5, %v881_v30 }
 0xa8f   :  { %v2044_v37 = vld [vmem:[%s2933_s5 + $0x1] ss:$0 sm:$0xff] }
 0xa90   :  { %v891_v38 = vmul.f32 %v889_v35, %v881_v30  ;;  %v890_v40 = vmul.f32 0.044715, %v884_v36  ;;  %v888_v54 = vmul.f32 0.5, %v884_v36 }
 0xa92   :  { %v893_v41 = vmul.f32 %v891_v38, %v881_v30  ;;  %v892_v43 = vmul.f32 %v890_v40, %v884_v36 }
 0xa94   :  { %v895_v44 = vadd.f32 %v893_v41, %v881_v30  ;;  %v894_v45 = vmul.f32 %v892_v43, %v884_v36  ;;  %v2038_v30 = vld [vmem:[%s2944_s15] ss:$0 sm:$0xff] }
 0xa96   :  { %v897_v46 = vmul.f32 0.7978846, %v895_v44  ;;  %v896_v47 = vadd.f32 %v894_v45, %v884_v36 }
 0xa98   :  { %2389 = vtanh.f32 %v897_v46  ;;  %v898_v48 = vmul.f32 0.7978846, %v896_v47 }
 0xa9a   :  { %2391 = vtanh.f32 %v898_v48 }
 0xaa2   :  { %v2390_v49 = vpop.eup %2389 }
 0xaa3   :  { %v901_v50 = vadd.f32 1.0, %v2390_v49 }
 0xaa4   :  { %v2392_v51 = vpop.eup %2391 }
 0xaa5   :  { %v902_v55 = vadd.f32 1.0, %v2392_v51  ;;  %v903_v56 = vmul.f32 %v901_v50, %v887_v52 }
 0xaa7   :  { %v904_v57 = vmul.f32 %v902_v55, %v888_v54 }
 0xaa9   :  { %v913_v58 = vpack.c.bf16 %v904_v57, %v903_v56 }
 0xaab   :  { %2246 = vmatmul.mubr.msk.bf16.vlgmr.msra.gmra.mrb[20].mxu0 %vm945_vm5, %v913_v58 }
 0xaac   :  { %2265 = vmatprep.mubr.msk.bf16.mxu0 %vm2426_vm1, %v2425_v15 }
 0xb7e   :  { %v983_v63 = vpop.f32.mrb[20].mxu0 }
 0xb7f   :  { %v984_v0 = vadd.f32 %v2031_v60, %v983_v63  ;;  %v2247_v1 = vpop.f32.mrb[21].mxu0 }
 0xb80   :  { %v986_v2 = vpop.f32.mrb[22].mxu0 }
 0xb81   :  { %v987_v3 = vadd.f32 %v2031_v60, %v986_v2  ;;  %v2248_v4 = vpop.f32.mrb[23].mxu0  ;;  %v990_v5 = vadd.f32 %v984_v0, %v817_v22 }
 0xb83   :  { %v994_v6 = vsel %vm66_vm0, %v990_v5, 0.0  ;;  %v991_v31 = vadd.f32 %v987_v3, %v818_v23 }
 0xb84   :  { %995 = vadd.xlane.f32.xlu0 %v994_v6 }
 0xb85   :  { %v997_v32 = vsel %vm66_vm0, %v991_v31, 0.0 }
 0xb86   :  { %998 = vadd.xlane.f32.xlu1 %v997_v32 }
 0xc11   :  { %v996_v7 = vpop.xlane.xlu0 %995 }
 0xc12   :  { %v1000_v8 = vmul.f32 0.03125, %v996_v7 }
 0xc13   :  { %v999_v9 = vpop.xlane.xlu1 %998 }
 0xc14   :  { %v1002_v10 = vsub.f32 %v990_v5, %v1000_v8  ;;  %v1001_v11 = vmul.f32 0.03125, %v999_v9 }
 0xc16   :  { %v1003_v12 = vsub.f32 %v991_v31, %v1001_v11  ;;  %v1004_v13 = vmul.f32 %v1002_v10, %v1002_v10 }
 0xc18   :  { %v1006_v14 = vsel %vm66_vm0, %v1004_v13, 0.0  ;;  %v1005_v16 = vmul.f32 %v1003_v12, %v1003_v12 }
 0xc19   :  { %1007 = vadd.xlane.f32.xlu0 %v1006_v14 }
 0xc1a   :  { %v1009_v42 = vsel %vm66_vm0, %v1005_v16, 0.0 }
 0xc1b   :  { %1010 = vadd.xlane.f32.xlu1 %v1009_v42 }
 0xca6   :  { %v1008_v19 = vpop.xlane.xlu0 %1007 }
 0xca7   :  { %v1012_v20 = vmul.f32 0.03125, %v1008_v19 }
 0xca8   :  { %v1011_v21 = vpop.xlane.xlu1 %1010 }
 0xca9   :  { %v1014_v22 = vadd.f32 1e-12, %v1012_v20  ;;  %v1013_v23 = vmul.f32 0.03125, %v1011_v21 }
 0xcab   :  { %2393 = vrsqrt.f32 %v1014_v22  ;;  %v1015_v24 = vadd.f32 1e-12, %v1013_v23 }
 0xcad   :  { %2395 = vrsqrt.f32 %v1015_v24 }
 0xcb5   :  { %v2394_v25 = vpop.eup %2393 }
 0xcb6   :  { %v1018_v26 = vmul.f32 %v2394_v25, %v1002_v10 }
 0xcb7   :  { %v2396_v27 = vpop.eup %2395 }
 0xcb8   :  { %v1026_v28 = vmul.f32 %v2037_v39, %v1018_v26  ;;  %v1019_v29 = vmul.f32 %v2396_v27, %v1003_v12 }
 0xcba   :  { %v1027_v33 = vmul.f32 %v2037_v39, %v1019_v29  ;;  %v2752_v34 = vadd.f32 %v2038_v30, %v1026_v28 }
 0xcbc   :  { %v2754_v35 = vadd.f32 %v2038_v30, %v1027_v33 }
 0xcbe   :  { %v1041_v36 = vpack.c.bf16 %v2754_v35, %v2752_v34 }
 0xcc0   :  { %2254 = vmatmul.mubr.msk.bf16.vlgmr.msra.gmra.mrb[28].mxu1 %vm66_vm0, %v1041_v36 }
 0xcc1   :  { %2259 = vmatprep.mubr.msk.bf16.mxu1 %vm2426_vm1, %v2425_v15 }
 0xd93   :  { %v1099_v38 = vpop.f32.mrb[28].mxu1 }
 0xd94   :  { %v1100_v40 = vadd.f32 %v2044_v37, %v1099_v38  ;;  %v2255_v41 = vpop.f32.mrb[29].mxu1 }
 0xd95   :  { %v1102_v43 = vpop.f32.mrb[30].mxu1 }
 0xd96   :  { %v2764_v44 = vpack.c.bf16 %v1100_v40, %v1100_v40  ;;  %v1103_v45 = vadd.f32 %v2044_v37, %v1102_v43  ;;  %v2256_v46 = vpop.f32.mrb[31].mxu1 }
 0xd98   :  { %v2766_v47 = vpack.c.bf16 %v1103_v45, %v1103_v45  ;;  %1109 = vrot.lane.b32.xlu0 %v2764_v44, %s2427_s3 }
 0xd9a   :  { %1158 = vrot.lane.b32.xlu1 %v2766_v47, %s2427_s3 }
 0xe0a   :  { %v1110_v48 = vpop.permute.xlu0 %1109 }
 0xe0b   :  { %v1115_v49 = vsel %vm219_vm2, %v1110_v48, 0 }
 0xe0c   :  { %2258 = vmatpush3.bf16.xpose.msra.mxu1 %v1115_v49  ;;  %v1159_v50 = vpop.permute.xlu1 %1158 }
 0xe0d   :  { %v1164_v51 = vsel %vm219_vm2, %v1159_v50, 0  ;;  %2269 = vmatprep.subr.bf16.mxu1 %v2425_v15 }
 0xe0e   :  { %2264 = vmatpush3.bf16.xpose.msra.mxu0 %v1164_v51 }
 0xe0f   :  { %2275 = vmatprep.subr.bf16.mxu0 %v2425_v15 }
 0xe13   :  { %2260 = vmatmul.mubr.msk.bf16.vlgmr.msra.gmra.mrb[32].mxu1 %vm219_vm2, %v2764_v44 }
 0xe14   :  { %2271 = vmatprep.mubr.msk.bf16.mxu1 %vm2426_vm1, %v2425_v15 }
 0xe15   :  { %2266 = vmatmul.mubr.msk.bf16.vlgmr.msra.gmra.mrb[24].mxu0 %vm219_vm2, %v2766_v47 }
 0xe16   :  { %2277 = vmatprep.mubr.msk.bf16.mxu0 %vm2426_vm1, %v2425_v15 }
 0xee6   :  { %v1151_v52 = vpop.f32.mrb[32].mxu1 }
 0xee7   :  { %v1152_v54 = vadd.f32 %v1151_v52, %v2600_v61  ;;  %v2261_v55 = vpop.f32.mrb[33].mxu1 }
 0xee8   :  { %v1154_v56 = vpop.f32.mrb[34].mxu1  ;;  %v1200_v57 = vpop.f32.mrb[24].mxu0 }
 0xee9   :  { %v1201_v58 = vadd.f32 %v1200_v57, %v2603_v62  ;;  %v2262_v60 = vpop.f32.mrb[35].mxu1  ;;  %v2267_v63 = vpop.f32.mrb[25].mxu0  ;;  %v1206_v0 = vsel %vm315_vm3, %v1152_v54, -inf }
 0xeea   :  { %v1203_v1 = vpop.f32.mrb[26].mxu0  ;;  %1207 = vmax.xlane.f32.xlu1 %v1206_v0 }
 0xeeb   :  { %v2268_v2 = vpop.f32.mrb[27].mxu0  ;;  %v1209_v3 = vsel %vm315_vm3, %v1201_v58, -inf }
 0xeec   :  { %1210 = vmax.xlane.f32.xlu0 %v1209_v3 }
 0xefb   :  { %1278 = vrot.lane.b32.xlu1 %v2766_v47, %s2429_s1 }
 0xeff   :  { %1332 = vrot.lane.b32.xlu1 %v2764_v44, %s2430_s0 }
 0xf77   :  { %v1208_v4 = vpop.xlane.xlu1 %1207 }
 0xf78   :  { %v1212_v5 = vsub.f32 %v1152_v54, %v1208_v4 }
 0xf79   :  { %v1211_v6 = vpop.xlane.xlu0 %1210 }
 0xf7a   :  { %v1214_v31 = vmul.f32 1.442695, %v1212_v5  ;;  %v1213_v32 = vsub.f32 %v1201_v58, %v1211_v6 }
 0xf7b   :  { %v1279_v7 = vpop.permute.xlu1 %1278 }
 0xf7c   :  { %2397 = vpow2.f32 %v1214_v31  ;;  %v1216_v8 = vmul.f32 1.442695, %v1213_v32  ;;  %v1284_v9 = vsel %vm345_vm4, %v1279_v7, 0 }
 0xf7d   :  { %2276 = vmatpush3.bf16.msra.mxu0 %v1284_v9 }
 0xf7e   :  { %2399 = vpow2.f32 %v1216_v8  ;;  %2287 = vmatprep.subr.bf16.mxu0 %v2425_v15 }
 0xf7f   :  { %v1333_v14 = vpop.permute.xlu1 %1332 }
 0xf80   :  { %v1338_v25 = vsel %vm219_vm2, %v1333_v14, 0 }
 0xf86   :  { %v2398_v10 = vpop.eup %2397 }
 0xf87   :  { %v1218_v11 = vsel %vm315_vm3, %v2398_v10, 0.0 }
 0xf88   :  { %v2400_v12 = vpop.eup %2399  ;;  %1219 = vadd.xlane.f32.xlu0 %v1218_v11 }
 0xf89   :  { %v1221_v13 = vsel %vm315_vm3, %v2400_v12, 0.0 }
 0xf8a   :  { %1222 = vadd.xlane.f32.xlu1 %v1221_v13 }
 0xf9b   :  { %1382 = vrot.lane.b32.xlu1 %v2766_v47, %s2430_s0 }
 0xf9e   :  { %1230 = vrot.lane.b32.xlu0 %v2764_v44, %s2429_s1 }
 0xf9f   :  { %1380 = vrot.lane.b32.xlu1 %v2766_v47, %s2431_s19 }
 0xfa2   :  { %1330 = vrot.lane.b32.xlu0 %v2764_v44, %s2431_s19 }
0x1015   :  { %v1220_v16 = vpop.xlane.xlu0 %1219 }
0x1016   :  { %2401 = vrcp.f32 %v1220_v16  ;;  %v2358_v16 = vld [vmem:[%s2935_s6 + $0x18] sm:$0xff]  }
0x1017   :  { %v1223_v42 = vpop.xlane.xlu1 %1222 }
0x1018   :  { %2403 = vrcp.f32 %v1223_v42 }
0x1019   :  { %v1231_v17 = vpop.permute.xlu0 %1230 }
0x101a   :  { %v1236_v18 = vsel %vm345_vm4, %v1231_v17, 0 }
0x101b   :  { %2270 = vmatpush3.bf16.msra.mxu1 %v1236_v18  ;;  %v1383_v24 = vpop.permute.xlu1 %1382 }
0x101c   :  { %2281 = vmatprep.subr.bf16.mxu1 %v2425_v15  ;;  %v1388_v26 = vsel %vm219_vm2, %v1383_v24, 0 }
0x101d   :  { %v1331_v27 = vpop.permute.xlu0 %1330 }
0x101f   :  { %v1381_v28 = vpop.permute.xlu1 %1380 }
0x1020   :  { %v2402_v19 = vpop.eup %2401 }
0x1021   :  { %v1226_v20 = vmul.f32 %v2402_v19, %v2398_v10 }
0x1022   :  { %v2404_v21 = vpop.eup %2403 }
0x1023   :  { %v1227_v22 = vmul.f32 %v2404_v21, %v2400_v12  ;;  %v1228_v23 = vpack.c.bf16 %v1226_v20, %v1226_v20 }
0x1025   :  { %2272 = vmatmul.mubr.msk.bf16.vlgmr.msra.gmra.mrb[36].mxu1 %vm315_vm3, %v1228_v23  ;;  %v1229_v39 = vpack.c.bf16 %v1227_v22, %v1227_v22 }
0x1026   :  { %2282 = vmatpush3.bf16.xpose.msra.mxu1 %v1338_v25  ;;  %2283 = vmatprep.mubr.msk.bf16.mxu1 %vm2426_vm1, %v2425_v15 }
0x1027   :  { %2278 = vmatmul.mubr.msk.bf16.vlgmr.msra.gmra.mrb[28].mxu0 %vm315_vm3, %v1229_v39  ;;  %2293 = vmatprep.subr.bf16.mxu1 %v2425_v15 }
0x1028   :  { %2288 = vmatpush3.bf16.xpose.msra.mxu0 %v1388_v26  ;;  %2289 = vmatprep.mubr.msk.bf16.mxu0 %vm2426_vm1, %v2425_v15 }
0x1029   :  { %2299 = vmatprep.subr.bf16.mxu0 %v2425_v15 }
0x102d   :  { %2284 = vmatmul.mubr.msk.bf16.vlgmr.msra.gmra.mrb[40].mxu1 %vm219_vm2, %v1331_v27 }
0x102e   :  { %2295 = vmatprep.mubr.msk.bf16.mxu1 %vm2426_vm1, %v2425_v15 }
0x102f   :  { %2290 = vmatmul.mubr.msk.bf16.vlgmr.msra.gmra.mrb[32].mxu0 %vm219_vm2, %v1381_v28 }
0x1030   :  { %2301 = vmatprep.mubr.msk.bf16.mxu0 %vm2426_vm1, %v2425_v15 }
0x10f8   :  { %v2822_v29 = vpop.f32.mrb[36].mxu1 }
0x10f9   :  { %v2273_v30 = vpop.f32.mrb[37].mxu1 }
0x10fa   :  { %v1275_v33 = vpop.f32.mrb[38].mxu1  ;;  %v1320_v36 = vpop.f32.mrb[28].mxu0 }
0x10fb   :  { %v1329_v37 = vpack.c.bf16 %v1320_v36, %v2822_v29  ;;  %v2274_v38 = vpop.f32.mrb[39].mxu1  ;;  %v2279_v40 = vpop.f32.mrb[29].mxu0  ;;  %v2065_v29 = vld [vmem:[%s2936_s7 + $0x1] ss:$0 sm:$0xff] }
0x10fc   :  { %v1323_v41 = vpop.f32.mrb[30].mxu0 }
0x10fd   :  { %v2280_v43 = vpop.f32.mrb[31].mxu0 }
0x1100   :  { %v1374_v45 = vpop.f32.mrb[40].mxu1 }
0x1101   :  { %v1375_v46 = vadd.f32 %v1374_v45, %v2600_v61  ;;  %v2285_v48 = vpop.f32.mrb[41].mxu1 }
0x1102   :  { %v1377_v49 = vpop.f32.mrb[42].mxu1  ;;  %v1424_v50 = vpop.f32.mrb[32].mxu0 }
0x1103   :  { %v1425_v51 = vadd.f32 %v1424_v50, %v2603_v62  ;;  %v2286_v52 = vpop.f32.mrb[43].mxu1  ;;  %v2291_v54 = vpop.f32.mrb[33].mxu0  ;;  %v1430_v55 = vsel %vm315_vm3, %v1375_v46, -inf }
0x1104   :  { %v1427_v56 = vpop.f32.mrb[34].mxu0  ;;  %1431 = vmax.xlane.f32.xlu0 %v1430_v55 }
0x1105   :  { %v2292_v57 = vpop.f32.mrb[35].mxu0  ;;  %v1433_v58 = vsel %vm315_vm3, %v1425_v51, -inf }
0x1106   :  { %1434 = vmax.xlane.f32.xlu1 %v1433_v58 }
0x1117   :  { %1502 = vrot.lane.b32.xlu1 %v2766_v47, %s2432_s4 }
0x1191   :  { %v1432_v60 = vpop.xlane.xlu0 %1431 }
0x1192   :  { %v1436_v61 = vsub.f32 %v1375_v46, %v1432_v60  ;;  %v2360_v60 = vld [vmem:[%s2937_s10 + $0x18] sm:$0xff]  }
0x1193   :  { %v1435_v63 = vpop.xlane.xlu1 %1434 }
0x1194   :  { %v1438_v0 = vmul.f32 1.442695, %v1436_v61  ;;  %v1437_v1 = vsub.f32 %v1425_v51, %v1435_v63 }
0x1196   :  { %2405 = vpow2.f32 %v1438_v0  ;;  %v1440_v62 = vmul.f32 1.442695, %v1437_v1 }
0x1197   :  { %v1503_v2 = vpop.permute.xlu1 %1502 }
0x1198   :  { %2407 = vpow2.f32 %v1440_v62  ;;  %v1508_v3 = vsel %vm345_vm4, %v1503_v2, 0 }
0x1199   :  { %2300 = vmatpush3.bf16.msra.mxu0 %v1508_v3 }
0x119a   :  { %2311 = vmatprep.subr.bf16.mxu0 %v2425_v15 }
0x11a0   :  { %v2406_v4 = vpop.eup %2405 }
0x11a1   :  { %v1442_v5 = vsel %vm315_vm3, %v2406_v4, 0.0 }
0x11a2   :  { %v2408_v6 = vpop.eup %2407  ;;  %1443 = vadd.xlane.f32.xlu0 %v1442_v5 }
0x11a3   :  { %v1445_v47 = vsel %vm315_vm3, %v2408_v6, 0.0 }
0x11a6   :  { %1446 = vadd.xlane.f32.xlu0 %v1445_v47 }
0x11bc   :  { %1454 = vrot.lane.b32.xlu0 %v2764_v44, %s2432_s4  ;;  %v2357_v44 = vld [vmem:[%s2935_s6 + $0x10] sm:$0xff]  }
0x122f   :  { %v1444_v31 = vpop.xlane.xlu0 %1443 }
0x1230   :  { %2409 = vrcp.f32 %v1444_v31 }
0x1233   :  { %v1447_v32 = vpop.xlane.xlu0 %1446 }
0x1234   :  { %2411 = vrcp.f32 %v1447_v32  ;;  %v2069_v32 = vld [vmem:[%s2939_s9 + $0x1] ss:$0 sm:$0xff] }
0x1237   :  { %v1455_v7 = vpop.permute.xlu0 %1454 }
0x1238   :  { %v1460_v8 = vsel %vm345_vm4, %v1455_v7, 0 }
0x1239   :  { %2294 = vmatpush3.bf16.msra.mxu1 %v1460_v8 }
0x123a   :  { %v2410_v9 = vpop.eup %2409  ;;  %2305 = vmatprep.subr.bf16.mxu1 %v2425_v15 }
0x123b   :  { %v1450_v10 = vmul.f32 %v2410_v9, %v2406_v4  ;;  %v2068_v4 = vld [vmem:[%s2938_s8 + $0x1] ss:$0 sm:$0xff] }
0x123d   :  { %v1452_v11 = vpack.c.bf16 %v1450_v10, %v1450_v10 }
0x123e   :  { %v2412_v12 = vpop.eup %2411 }
0x123f   :  { %v1451_v13 = vmul.f32 %v2412_v12, %v2408_v6  ;;  %2296 = vmatmul.mubr.msk.bf16.vlgmr.msra.gmra.mrb[44].mxu1 %vm315_vm3, %v1452_v11  ;;  %v2361_v11 = vld [vmem:[%s2940_s12 + $0x20] sm:$0xff]   ;;  %v2362_v12 = vld [vmem:[%s2940_s12 + $0x28] sm:$0xff]  }
0x1240   :  { %2307 = vmatprep.mubr.msk.bf16.mxu1 %vm2426_vm1, %v2425_v15  ;;  %2306 = vmatpush3.bf16.msra.mxu1 %v2358_v16 }
0x1241   :  { %v1453_v14 = vpack.c.bf16 %v1451_v13, %v1451_v13  ;;  %2317 = vmatprep.subr.bf16.mxu1 %v2425_v15  ;;  %v2363_v13 = vld [vmem:[%s2940_s12 + $0x30] sm:$0xff]  }
0x1243   :  { %2302 = vmatmul.mubr.msk.bf16.vlgmr.msra.gmra.mrb[36].mxu0 %vm315_vm3, %v1453_v14  ;;  %v2075_v14 = vld [vmem:[%s2941_s11 + $0x1] ss:$0 sm:$0xff] }
0x1244   :  { %2312 = vmatpush3.bf16.msra.mxu0 %v2357_v44  ;;  %2313 = vmatprep.mubr.msk.bf16.mxu0 %vm2426_vm1, %v2425_v15  ;;  %v2364_v44 = vld [vmem:[%s2940_s12 + $0x38] sm:$0xff]  }
0x1245   :  { %2325 = vmatprep.subr.bf16.mxu0 %v2425_v15 }
0x124b   :  { %2314 = vmatmul.mubr.msk.bf16.vlgmr.msra.gmra.mrb[40].mxu0 %vm219_vm2, %v1329_v37 }
0x124c   :  { %2333 = vmatprep.mubr.msk.bf16.mxu0 %vm2426_vm1, %v2425_v15  ;;  %2326 = vmatpush3.bf16.msra.mxu0 %v2361_v11  ;;  %v2097_v11 = vld [vmem:[%s2944_s15 + $0x1] ss:$0 sm:$0xff] }
0x124d   :  { %2327 = vmatprep.subr.bf16.mxu0 %v2425_v15 }
0x1250   :  { %2328 = vmatpush3.bf16.msra.mxu0 %v2362_v12 }
0x1251   :  { %2329 = vmatprep.subr.bf16.mxu0 %v2425_v15 }
0x1254   :  { %2330 = vmatpush3.bf16.msra.mxu0 %v2363_v13 }
0x1255   :  { %2331 = vmatprep.subr.bf16.mxu0 %v2425_v15 }
0x1258   :  { %2332 = vmatpush3.bf16.msra.mxu0 %v2364_v44 }
0x1312   :  { %v1496_v42 = vpop.f32.mrb[44].mxu1 }
0x1313   :  { %v2297_v17 = vpop.f32.mrb[45].mxu1 }
0x1314   :  { %v1499_v18 = vpop.f32.mrb[46].mxu1 }
0x1315   :  { %v2298_v19 = vpop.f32.mrb[47].mxu1 }
0x1316   :  { %v1544_v20 = vpop.f32.mrb[36].mxu0 }
0x1317   :  { %v1553_v21 = vpack.c.bf16 %v1544_v20, %v1496_v42  ;;  %v2303_v22 = vpop.f32.mrb[37].mxu0 }
0x1318   :  { %v1547_v23 = vpop.f32.mrb[38].mxu0 }
0x1319   :  { %v2304_v24 = vpop.f32.mrb[39].mxu0  ;;  %2308 = vmatmul.mubr.msk.bf16.vlgmr.msra.gmra.mrb[48].mxu1 %vm219_vm2, %v1553_v21 }
0x131a   :  { %2321 = vmatprep.mubr.msk.bf16.mxu1 %vm2426_vm1, %v2425_v15 }
0x131e   :  { %v1647_v25 = vpop.f32.mrb[40].mxu0 }
0x131f   :  { %v2315_v39 = vpop.f32.mrb[41].mxu0 }
0x1320   :  { %v1650_v26 = vpop.f32.mrb[42].mxu0 }
0x1321   :  { %v2316_v27 = vpop.f32.mrb[43].mxu0 }
0x13ec   :  { %v1597_v28 = vpop.f32.mrb[48].mxu1 }
0x13ed   :  { %v1648_v30 = vadd.f32 %v1647_v25, %v1597_v28  ;;  %v2309_v33 = vpop.f32.mrb[49].mxu1 }
0x13ee   :  { %v1600_v36 = vpop.f32.mrb[50].mxu1 }
0x13ef   :  { %v1662_v37 = vadd.f32 %v2065_v29, %v1648_v30  ;;  %v1651_v38 = vadd.f32 %v1650_v26, %v1600_v36  ;;  %v2310_v40 = vpop.f32.mrb[51].mxu1 }
0x13f1   :  { %v1663_v41 = vadd.f32 %v2065_v29, %v1651_v38  ;;  %v1664_v43 = vadd.f32 %v1662_v37, %v2752_v34 }
0x13f3   :  { %v1670_v45 = vsel %vm66_vm0, %v1664_v43, 0.0  ;;  %v1665_v46 = vadd.f32 %v1663_v41, %v2754_v35  ;;  %v2359_v35 = vld [vmem:[%s2937_s10 + $0x10] sm:$0xff]  }
0x13f4   :  { %1671 = vadd.xlane.f32.xlu1 %v1670_v45  ;;  %2318 = vmatpush3.bf16.msra.mxu1 %v2359_v35  ;;  %v2088_v45 = vld [vmem:[%s2942_s13 + $0x1] ss:$0 sm:$0xff] }
0x13f5   :  { %v1673_v48 = vsel %vm66_vm0, %v1665_v46, 0.0  ;;  %2319 = vmatprep.subr.bf16.mxu1 %v2425_v15 }
0x13f6   :  { %1674 = vadd.xlane.f32.xlu0 %v1673_v48 }
0x13f8   :  { %2320 = vmatpush3.bf16.msra.mxu1 %v2360_v60 }
0x1481   :  { %v1672_v49 = vpop.xlane.xlu1 %1671 }
0x1482   :  { %v1676_v50 = vmul.f32 0.03125, %v1672_v49 }
0x1483   :  { %v1675_v51 = vpop.xlane.xlu0 %1674 }
0x1484   :  { %v1678_v52 = vsub.f32 %v1664_v43, %v1676_v50  ;;  %v1677_v54 = vmul.f32 0.03125, %v1675_v51 }
0x1486   :  { %v1679_v55 = vsub.f32 %v1665_v46, %v1677_v54  ;;  %v1680_v56 = vmul.f32 %v1678_v52, %v1678_v52 }
0x1488   :  { %v1682_v57 = vsel %vm66_vm0, %v1680_v56, 0.0  ;;  %v1681_v58 = vmul.f32 %v1679_v55, %v1679_v55 }
0x1489   :  { %1683 = vadd.xlane.f32.xlu0 %v1682_v57 }
0x148a   :  { %v1685_v34 = vsel %vm66_vm0, %v1681_v58, 0.0 }
0x148b   :  { %1686 = vadd.xlane.f32.xlu1 %v1685_v34 }
0x1516   :  { %v1684_v61 = vpop.xlane.xlu0 %1683 }
0x1517   :  { %v1688_v63 = vmul.f32 0.03125, %v1684_v61 }
0x1518   :  { %v1687_v0 = vpop.xlane.xlu1 %1686 }
0x1519   :  { %v1690_v1 = vadd.f32 1e-12, %v1688_v63  ;;  %v1689_v62 = vmul.f32 0.03125, %v1687_v0 }
0x151b   :  { %2413 = vrsqrt.f32 %v1690_v1  ;;  %v1691_v2 = vadd.f32 1e-12, %v1689_v62 }
0x151d   :  { %2415 = vrsqrt.f32 %v1691_v2 }
0x1525   :  { %v2414_v3 = vpop.eup %2413 }
0x1526   :  { %v1694_v5 = vmul.f32 %v2414_v3, %v1678_v52  ;;  %v23_v3 = vstv %s2945_s17 }
0x1527   :  { %v2416_v6 = vpop.eup %2415  ;;  %24 = vst [vmem:[#allocation2] sm:$0x1] %v23_v3 }
0x1528   :  { %v1702_v47 = vmul.f32 %v2068_v4, %v1694_v5  ;;  %v1695_v31 = vmul.f32 %v2416_v6, %v1679_v55 }
0x152a   :  { %v1703_v7 = vmul.f32 %v2068_v4, %v1695_v31  ;;  %v1710_v8 = vadd.f32 %v2069_v32, %v1702_v47 }
0x152c   :  { %v1711_v9 = vadd.f32 %v2069_v32, %v1703_v7 }
0x152e   :  { %v1717_v10 = vpack.c.bf16 %v1711_v9, %v1710_v8 }
0x1530   :  { %2322 = vmatmul.mubr.msk.bf16.vlgmr.msra.gmra.mrb[52].mxu1 %vm66_vm0, %v1717_v10 }
0x1603   :  { %v1775_v16 = vpop.f32.mrb[52].mxu1 }
0x1604   :  { %v1776_v42 = vadd.f32 %v2075_v14, %v1775_v16  ;;  %v2323_v17 = vpop.f32.mrb[53].mxu1 }
0x1605   :  { %v1778_v18 = vpop.f32.mrb[54].mxu1 }
0x1606   :  { %v1784_v19 = vmul.f32 0.044715, %v1776_v42  ;;  %v1779_v20 = vadd.f32 %v2075_v14, %v1778_v18  ;;  %v2324_v21 = vpop.f32.mrb[55].mxu1  ;;  %v1782_v36 = vmul.f32 0.5, %v1776_v42 }
0x1608   :  { %v1786_v22 = vmul.f32 %v1784_v19, %v1776_v42  ;;  %v1785_v23 = vmul.f32 0.044715, %v1779_v20  ;;  %v1783_v37 = vmul.f32 0.5, %v1779_v20 }
0x160a   :  { %v1788_v24 = vmul.f32 %v1786_v22, %v1776_v42  ;;  %v1787_v25 = vmul.f32 %v1785_v23, %v1779_v20 }
0x160c   :  { %v1790_v39 = vadd.f32 %v1788_v24, %v1776_v42  ;;  %v1789_v26 = vmul.f32 %v1787_v25, %v1779_v20 }
0x160e   :  { %v1792_v27 = vmul.f32 0.7978846, %v1790_v39  ;;  %v1791_v15 = vadd.f32 %v1789_v26, %v1779_v20 }
0x1610   :  { %2417 = vtanh.f32 %v1792_v27  ;;  %v1793_v28 = vmul.f32 0.7978846, %v1791_v15 }
0x1612   :  { %2419 = vtanh.f32 %v1793_v28 }
0x161a   :  { %v2418_v29 = vpop.eup %2417 }
0x161b   :  { %v1796_v30 = vadd.f32 1.0, %v2418_v29 }
0x161c   :  { %v2420_v33 = vpop.eup %2419 }
0x161d   :  { %v1797_v38 = vadd.f32 1.0, %v2420_v33  ;;  %v1798_v40 = vmul.f32 %v1796_v30, %v1782_v36 }
0x161f   :  { %v1799_v41 = vmul.f32 %v1797_v38, %v1783_v37 }
0x1621   :  { %v1809_v43 = vpack.c.bf16 %v1799_v41, %v1798_v40  ;;  %v1974_v40 = vsub.s32 1, %v2593_v53 }
0x1623   :  { %2334 = vmatmul.mubr.msk.bf16.vlgmr.msra.gmra.mrb[44].mxu0 %vm945_vm5, %v1809_v43 }
0x16f6   :  { %v1879_v46 = vpop.f32.mrb[44].mxu0 }
0x16f7   :  { %v1880_v48 = vadd.f32 %v2088_v45, %v1879_v46  ;;  %v2335_v49 = vpop.f32.mrb[45].mxu0 }
0x16f8   :  { %v1882_v50 = vpop.f32.mrb[46].mxu0 }
0x16f9   :  { %v1883_v51 = vadd.f32 %v2088_v45, %v1882_v50  ;;  %v2336_v52 = vpop.f32.mrb[47].mxu0  ;;  %v1886_v54 = vadd.f32 %v1880_v48, %v1710_v8  ;;  %v2096_v8 = vld [vmem:[%s2943_s14 + $0x1] ss:$0 sm:$0xff] }
0x16fa   :  { %v1965_v48 = vld [vmem:[%s2946_s16] sm:$0x3] }
0x16fb   :  { %v1892_v55 = vsel %vm66_vm0, %v1886_v54, 0.0  ;;  %v1887_v56 = vadd.f32 %v1883_v51, %v1711_v9  ;;  %v1969_v52 = vrot.slane %v1965_v48, %v2597_v59 }
0x16fc   :  { %1893 = vadd.xlane.f32.xlu1 %v1892_v55 }
0x16fd   :  { %v1895_v57 = vsel %vm66_vm0, %v1887_v56, 0.0 }
0x16fe   :  { %1896 = vadd.xlane.f32.xlu0 %v1895_v57 }
0x1789   :  { %v1894_v58 = vpop.xlane.xlu1 %1893 }
0x178a   :  { %v1898_v34 = vmul.f32 0.03125, %v1894_v58 }
0x178b   :  { %v1897_v35 = vpop.xlane.xlu0 %1896 }
0x178c   :  { %v1900_v60 = vsub.f32 %v1886_v54, %v1898_v34  ;;  %v1899_v61 = vmul.f32 0.03125, %v1897_v35 }
0x178e   :  { %v1901_v63 = vsub.f32 %v1887_v56, %v1899_v61  ;;  %v1902_v0 = vmul.f32 %v1900_v60, %v1900_v60  ;;  %v1975_v56 = vrot.slane %v1965_v48, %v1974_v40 }
0x1790   :  { %v1904_v1 = vsel %vm66_vm0, %v1902_v0, 0.0  ;;  %v1903_v62 = vmul.f32 %v1901_v63, %v1901_v63 }
0x1791   :  { %1905 = vadd.xlane.f32.xlu1 %v1904_v1  ;;  %v2098_v1 = vld [vmem:[#allocation2] ss:$0 sm:$0xff] }
0x1792   :  { %v1907_v2 = vsel %vm66_vm0, %v1903_v62, 0.0 }
0x1793   :  { %1908 = vadd.xlane.f32.xlu0 %v1907_v2 }
0x181e   :  { %v1906_v4 = vpop.xlane.xlu1 %1905 }
0x181f   :  { %v1910_v5 = vmul.f32 0.03125, %v1906_v4 }
0x1820   :  { %v1909_v6 = vpop.xlane.xlu0 %1908 }
0x1821   :  { %v1912_v47 = vadd.f32 1e-12, %v1910_v5  ;;  %v1911_v31 = vmul.f32 0.03125, %v1909_v6 }
0x1823   :  { %2421 = vrsqrt.f32 %v1912_v47  ;;  %v1913_v32 = vadd.f32 1e-12, %v1911_v31 }
0x1825   :  { %2423 = vrsqrt.f32 %v1913_v32 }
0x182d   :  { %v2422_v7 = vpop.eup %2421 }
0x182e   :  { %v1916_v9 = vmul.f32 %v2422_v7, %v1900_v60 }
0x182f   :  { %v2424_v10 = vpop.eup %2423 }
0x1830   :  { %v1924_v12 = vmul.f32 %v2096_v8, %v1916_v9  ;;  %v1917_v13 = vmul.f32 %v2424_v10, %v1901_v63 }
0x1832   :  { %v1932_v44 = vadd.f32 %v2097_v11, %v1924_v12  ;;  %v1925_v14 = vmul.f32 %v2096_v8, %v1917_v13 }
0x1834   :  { %v1933_v16 = vadd.f32 %v2097_v11, %v1925_v14  ;;  %v1934_v42 = vsel %vm66_vm0, %v1932_v44, 0.0  ;;  %v1951_v17 = vsel %vm66_vm0, %v1932_v44, -inf }
0x1835   :  { %v1935_v18 = vrot.slane %v1934_v42, 4  ;;  %v1952_v19 = vrot.slane %v1951_v17, 4 }
0x1836   :  { %v1941_v20 = vsel %vm66_vm0, %v1933_v16, 0.0  ;;  %v1958_v21 = vsel %vm66_vm0, %v1933_v16, -inf }
0x1837   :  { %v1936_v22 = vadd.f32 %v1935_v18, %v1934_v42  ;;  %v1942_v23 = vrot.slane %v1941_v20, 4  ;;  %v1953_v24 = vmax.f32 %v1951_v17, %v1952_v19  ;;  %v1959_v25 = vrot.slane %v1958_v21, 4 }
0x1839   :  { %v1937_v39 = vrot.slane %v1936_v22, 2  ;;  %v1943_v26 = vadd.f32 %v1942_v23, %v1941_v20  ;;  %v1954_v27 = vrot.slane %v1953_v24, 2  ;;  %v1960_v15 = vmax.f32 %v1958_v21, %v1959_v25 }
0x183b   :  { %v1938_v28 = vadd.f32 %v1937_v39, %v1936_v22  ;;  %v1944_v29 = vrot.slane %v1943_v26, 2  ;;  %v1955_v30 = vmax.f32 %v1953_v24, %v1954_v27  ;;  %v1961_v33 = vrot.slane %v1960_v15, 2 }
0x183d   :  { %v1939_v36 = vrot.slane %v1938_v28, 1  ;;  %v1945_v37 = vadd.f32 %v1944_v29, %v1943_v26  ;;  %v1962_v38 = vmax.f32 %v1960_v15, %v1961_v33  ;;  %v1956_v45 = vrot.slane %v1955_v30, 1 }
0x183f   :  { %v1940_v41 = vadd.f32 %v1939_v36, %v1938_v28  ;;  %v1946_v43 = vrot.slane %v1945_v37, 1  ;;  %v1963_v46 = vrot.slane %v1962_v38, 1  ;;  %v1957_v55 = vmax.f32 %v1955_v30, %v1956_v45 }
0x1841   :  { %v1947_v49 = vadd.f32 %v1946_v43, %v1945_v37  ;;  %v1949_v50 = vmul.f32 0.125, %v1940_v41  ;;  %v1964_v51 = vmax.f32 %v1962_v38, %v1963_v46  ;;  %v1976_v53 = vmul.f32 %v1975_v56, %v1957_v55 }
0x1843   :  { %v1950_v54 = vmul.f32 0.125, %v1947_v49  ;;  %v1970_v57 = vmul.f32 %v1969_v52, %v1949_v50  ;;  %v1977_v34 = vmul.f32 %v1975_v56, %v1964_v51 }
0x1845   :  { %v1971_v58 = vmul.f32 %v1969_v52, %v1950_v54  ;;  %v1978_v60 = vadd.f32 %v1976_v53, %v1970_v57 }
0x1847   :  { %v1979_v35 = vadd.f32 %v1977_v34, %v1971_v58 }
0x1849   :  { %v1982_v61 = vrot.slane %v1979_v35, 7 }
0x184b   :  { %v1984_v63 = vsel %vm1983_vm6, %v1982_v61, %v1978_v60 }
0x184c   :  { %v1987_v0 = vsel %vm1986_vm7, %v1984_v63, 0.0 }
0x184d   :  { %1988 = vadd.xlane.f32.xlu0 %v1987_v0 }
0x18da   :  { %v1989_v62 = vpop.xlane.xlu0 %1988 }
0x18db   :  { %v1997_v2 = vadd.f32 %v2098_v1, %v1989_v62 }
0x18dd   :  { %1999 = vst.msk [vmem:[%s2947_s18] sm:$0x3] %vm1998_vm8, %v1997_v2 }

</bundles_post_ra>
